<compile_context>
chip_gen: v7x
topology: tpu7x:2x2x1
jax: 0.10.0
libtpu: 0.0.40
codegen_flags: <defaults>
</compile_context>

<pallas_src>
import functools

import jax
import jax.numpy as jnp
from jax.experimental import pallas as pl
from jax.experimental.pallas import tpu as pltpu

IN_DIM = 784
HID_DIM = 400
LAT_DIM = 20

# Padded (lane-aligned) extents.
IN_P = 896      # 7 * 128
HID_P = 512     # 4 * 128
LAT_P = 128     # mu||logvar||zeros, one full lane group


def _round_up(n, m):
    return ((n + m - 1) // m) * m


def _vae_kernel(x_ref, eps_ref,
                w1_ref, b1_ref,
                wenc_ref, benc_ref,
                w3_ref, b3_ref,
                w4_ref, b4_ref,
                recon_ref, lat_ref):
    bf16 = jnp.bfloat16

    # encode: h1 = relu(x @ W1 + b1)
    x = x_ref[...].astype(bf16)                                       # [TB, IN_P]
    h1 = jnp.dot(x, w1_ref[...], preferred_element_type=jnp.float32) + b1_ref[...]
    h1 = jnp.maximum(h1, 0.0)                                         # [TB, HID_P] f32

    # fused fc21 || fc22 head (zero-padded to 128 lanes -> lane-dense output)
    enc = jnp.dot(h1.astype(bf16), wenc_ref[...],
                  preferred_element_type=jnp.float32) + benc_ref[...]  # [TB, LAT_P] f32
    mu = enc[:, :LAT_DIM]
    logvar = enc[:, LAT_DIM:2 * LAT_DIM]

    # reparametrize: z = mu + eps * exp(0.5 * logvar)
    z = mu + eps_ref[...] * jnp.exp(0.5 * logvar)                      # [TB, LAT] f32

    # decode: sigmoid(relu(z @ W3 + b3) @ W4 + b4)
    h3 = jnp.dot(z.astype(bf16), w3_ref[...],
                 preferred_element_type=jnp.float32) + b3_ref[...]
    h3 = jnp.maximum(h3, 0.0)
    logits = jnp.dot(h3.astype(bf16), w4_ref[...],
                     preferred_element_type=jnp.float32) + b4_ref[...]

    recon_ref[...] = jax.nn.sigmoid(logits)                            # [TB, IN_P]
    lat_ref[...] = enc                                                 # [TB, LAT_P]


def prepare_params(params):
    """One-time ('offline') weight prep: pad to lane-aligned extents, fuse
    fc21/fc22 into one head, cast weights to bf16 (biases stay f32)."""
    bf16 = jnp.bfloat16
    w1 = jnp.pad(params["w1"], ((0, IN_P - IN_DIM), (0, HID_P - HID_DIM))).astype(bf16)
    b1 = jnp.pad(params["b1"], ((0, 0), (0, HID_P - HID_DIM)))

    wenc = jnp.concatenate([params["w21"], params["w22"]], axis=1)      # [400, 40]
    wenc = jnp.pad(wenc, ((0, HID_P - HID_DIM), (0, LAT_P - 2 * LAT_DIM))).astype(bf16)
    benc = jnp.concatenate([params["b21"], params["b22"]], axis=1)      # [1, 40]
    benc = jnp.pad(benc, ((0, 0), (0, LAT_P - 2 * LAT_DIM)))

    w3 = jnp.pad(params["w3"], ((0, 0), (0, HID_P - HID_DIM))).astype(bf16)   # [20, 512]
    b3 = jnp.pad(params["b3"], ((0, 0), (0, HID_P - HID_DIM)))
    w4 = jnp.pad(params["w4"], ((0, HID_P - HID_DIM), (0, IN_P - IN_DIM))).astype(bf16)
    b4 = jnp.pad(params["b4"], ((0, 0), (0, IN_P - IN_DIM)))
    return dict(w1=w1, b1=b1, wenc=wenc, benc=benc, w3=w3, b3=b3, w4=w4, b4=b4)


def vae_forward(x, prep, eps, *, batch_tile=256):
    """Pallas VAE forward.  x: [B, 784] f32, eps: [B, 20] f32.
    batch_tile: 256 for v6e/v7x (MXU height), 128 is a good choice on v5e."""
    B = x.shape[0]
    TB = min(batch_tile, _round_up(B, 8))
    B_pad = _round_up(B, TB)

    x_p = jnp.pad(x.astype(jnp.float32), ((0, B_pad - B), (0, IN_P - IN_DIM)))
    eps_p = jnp.pad(eps.astype(jnp.float32), ((0, B_pad - B), (0, 0)))

    grid = (B_pad // TB,)
    batch_spec = lambda shape: pl.BlockSpec(shape, lambda i: (i, 0))
    resident = lambda shape: pl.BlockSpec(shape, lambda i: (0, 0))   # fetched once

    in_specs = [
        batch_spec((TB, IN_P)),            # x
        batch_spec((TB, LAT_DIM)),         # eps
        resident((IN_P, HID_P)),           # w1
        resident((1, HID_P)),              # b1
        resident((HID_P, LAT_P)),          # wenc (fc21||fc22, padded)
        resident((1, LAT_P)),              # benc
        resident((LAT_DIM, HID_P)),        # w3
        resident((1, HID_P)),              # b3
        resident((HID_P, IN_P)),           # w4
        resident((1, IN_P)),               # b4
    ]
    out_specs = (
        batch_spec((TB, IN_P)),            # reconstruction (padded)
        batch_spec((TB, LAT_P)),           # latent slab: mu || logvar || 0
    )

    weight_bytes = 2 * (IN_P * HID_P + HID_P * LAT_P + LAT_DIM * HID_P + HID_P * IN_P) \
        + 4 * (HID_P + LAT_P + HID_P + IN_P)
    cost = pl.CostEstimate(
        flops=2 * B_pad * (IN_P * HID_P + HID_P * LAT_P + LAT_DIM * HID_P + HID_P * IN_P),
        transcendentals=B_pad * (LAT_DIM + IN_P),
        bytes_accessed=weight_bytes + 4 * B_pad * (IN_P + LAT_DIM + IN_P + LAT_P),
    )

    recon_p, lat_p = pl.pallas_call(
        _vae_kernel,
        grid=grid,
        in_specs=in_specs,
        out_specs=out_specs,
        out_shape=(
            jax.ShapeDtypeStruct((B_pad, IN_P), jnp.float32),
            jax.ShapeDtypeStruct((B_pad, LAT_P), jnp.float32),
        ),
        compiler_params=pltpu.CompilerParams(
            dimension_semantics=("parallel",),
            vmem_limit_bytes=16 << 20,
        ),
        cost_estimate=cost,
    )(x_p, eps_p,
      prep["w1"], prep["b1"], prep["wenc"], prep["benc"],
      prep["w3"], prep["b3"], prep["w4"], prep["b4"])

    recon = recon_p[:B, :IN_DIM]
    mu = lat_p[:B, :LAT_DIM]
    logvar = lat_p[:B, LAT_DIM:2 * LAT_DIM]
    return recon, mu, logvar


def init_params(key):
    """Deterministic init mimicking PyTorch nn.Linear defaults (U[-1/sqrt(fan_in), +]).
    Weights stored as [in_features, out_features] so y = x @ W + b."""
    def linear(k, fan_in, fan_out):
        kw, kb = jax.random.split(k)
        bound = 1.0 / jnp.sqrt(fan_in)
        w = jax.random.uniform(kw, (fan_in, fan_out), jnp.float32, -bound, bound)
        b = jax.random.uniform(kb, (1, fan_out), jnp.float32, -bound, bound)
        return w, b

    k1, k21, k22, k3, k4 = jax.random.split(key, 5)
    w1, b1 = linear(k1, IN_DIM, HID_DIM)
    w21, b21 = linear(k21, HID_DIM, LAT_DIM)
    w22, b22 = linear(k22, HID_DIM, LAT_DIM)
    w3, b3 = linear(k3, LAT_DIM, HID_DIM)
    w4, b4 = linear(k4, HID_DIM, IN_DIM)
    return dict(w1=w1, b1=b1, w21=w21, b21=b21, w22=w22, b22=b22,
                w3=w3, b3=b3, w4=w4, b4=b4)


def vae_forward_ref(x, params, eps):
    """Pure-JAX reference (mirrors the kernel's bf16 weights / f32 accumulation)."""
    bf16 = jnp.bfloat16

    def lin(a, w, b):
        return jnp.dot(a.astype(bf16), w.astype(bf16),
                       preferred_element_type=jnp.float32) + b

    h1 = jnp.maximum(lin(x, params["w1"], params["b1"]), 0.0)
    mu = lin(h1, params["w21"], params["b21"])
    logvar = lin(h1, params["w22"], params["b22"])
    z = mu + eps * jnp.exp(0.5 * logvar)
    h3 = jnp.maximum(lin(z, params["w3"], params["b3"]), 0.0)
    recon = jax.nn.sigmoid(lin(h3, params["w4"], params["b4"]))
    return recon, mu, logvar


if __name__ == "__main__":
    key = jax.random.PRNGKey(0)
    k_params, k_x, k_eps = jax.random.split(key, 3)

    B = 2
    params = init_params(k_params)
    prep = prepare_params(params)
    x = jax.random.uniform(k_x, (B, IN_DIM), jnp.float32)       # MNIST-like pixels in [0,1)
    eps = jax.random.normal(k_eps, (B, LAT_DIM), jnp.float32)   # torch.randn_like(std) equivalent

    recon, mu, logvar = jax.block_until_ready(vae_forward(x, prep, eps))

    recon_r, mu_r, logvar_r = vae_forward_ref(x, params, eps)
    assert recon.shape == (B, IN_DIM) and mu.shape == (B, LAT_DIM) and logvar.shape == (B, LAT_DIM)
    assert jnp.allclose(recon, recon_r, atol=1e-3, rtol=1e-3)
    assert jnp.allclose(mu, mu_r, atol=1e-3, rtol=1e-3)
    assert jnp.allclose(logvar, logvar_r, atol=1e-3, rtol=1e-3)

    print("KERNEL_OK")
</pallas_src>

<mosaic_0001>
module attributes {stable_mosaic.version = 11 : i64} {
  func.func @_vae_kernel(%arg0: i32, %arg1: memref<8x896xf32, #tpu.memory_space<vmem>>, %arg2: memref<8x20xf32, #tpu.memory_space<vmem>>, %arg3: memref<896x512xbf16, #tpu.memory_space<vmem>>, %arg4: memref<1x512xf32, #tpu.memory_space<vmem>>, %arg5: memref<512x128xbf16, #tpu.memory_space<vmem>>, %arg6: memref<1x128xf32, #tpu.memory_space<vmem>>, %arg7: memref<20x512xbf16, #tpu.memory_space<vmem>>, %arg8: memref<1x512xf32, #tpu.memory_space<vmem>>, %arg9: memref<512x896xbf16, #tpu.memory_space<vmem>>, %arg10: memref<1x896xf32, #tpu.memory_space<vmem>>, %arg11: memref<8x896xf32, #tpu.memory_space<vmem>>, %arg12: memref<8x128xf32, #tpu.memory_space<vmem>>) attributes {dimension_semantics = [#tpu.dimension_semantics<parallel>], iteration_bounds = array<i64: 1>, scalar_prefetch = 0 : i64, scratch_operands = 0 : i64, tpu.core_type = #tpu.core_type<tc>, window_params = [{transform_indices = @transform_0, window_bounds = array<i64: 8, 896>}, {transform_indices = @transform_1, window_bounds = array<i64: 8, 20>}, {pipeline_mode = #tpu.pipeline_mode<synchronous>, transform_indices = @transform_2, window_bounds = array<i64: 896, 512>}, {pipeline_mode = #tpu.pipeline_mode<synchronous>, transform_indices = @transform_3, window_bounds = array<i64: 1, 512>}, {pipeline_mode = #tpu.pipeline_mode<synchronous>, transform_indices = @transform_4, window_bounds = array<i64: 512, 128>}, {pipeline_mode = #tpu.pipeline_mode<synchronous>, transform_indices = @transform_5, window_bounds = array<i64: 1, 128>}, {pipeline_mode = #tpu.pipeline_mode<synchronous>, transform_indices = @transform_6, window_bounds = array<i64: 20, 512>}, {pipeline_mode = #tpu.pipeline_mode<synchronous>, transform_indices = @transform_7, window_bounds = array<i64: 1, 512>}, {pipeline_mode = #tpu.pipeline_mode<synchronous>, transform_indices = @transform_8, window_bounds = array<i64: 512, 896>}, {pipeline_mode = #tpu.pipeline_mode<synchronous>, transform_indices = @transform_9, window_bounds = array<i64: 1, 896>}, {transform_indices = @transform_10, window_bounds = array<i64: 8, 896>}, {transform_indices = @transform_11, window_bounds = array<i64: 8, 128>}]} {
    %c0 = arith.constant 0 : index
    %c0_0 = arith.constant 0 : index
    %0 = vector.load %arg1[%c0, %c0_0] : memref<8x896xf32, #tpu.memory_space<vmem>>, vector<8x896xf32>
    %1 = arith.truncf %0 : vector<8x896xf32> to vector<8x896xbf16>
    %c0_1 = arith.constant 0 : index
    %c0_2 = arith.constant 0 : index
    %2 = vector.load %arg3[%c0_1, %c0_2] : memref<896x512xbf16, #tpu.memory_space<vmem>>, vector<896x512xbf16>
    %cst = arith.constant dense<0.000000e+00> : vector<8x512xf32>
    %3 = tpu.matmul %1, %2, %cst {dimension_numbers = #tpu.dot_dimension_numbers<[1], [0], [0], [1], [0, 0, 1, 1], [], []>} : vector<8x896xbf16>, vector<896x512xbf16>, vector<8x512xf32> -> vector<8x512xf32>
    %c0_3 = arith.constant 0 : index
    %c0_4 = arith.constant 0 : index
    %4 = vector.load %arg4[%c0_3, %c0_4] : memref<1x512xf32, #tpu.memory_space<vmem>>, vector<1x512xf32>
    %5 = vector.broadcast %4 : vector<1x512xf32> to vector<8x512xf32>
    %6 = arith.addf %3, %5 : vector<8x512xf32>
    %cst_5 = arith.constant 0.000000e+00 : f32
    %7 = vector.broadcast %cst_5 : f32 to vector<8x512xf32>
    %8 = arith.maximumf %6, %7 : vector<8x512xf32>
    %9 = arith.truncf %8 : vector<8x512xf32> to vector<8x512xbf16>
    %c0_6 = arith.constant 0 : index
    %c0_7 = arith.constant 0 : index
    %10 = vector.load %arg5[%c0_6, %c0_7] : memref<512x128xbf16, #tpu.memory_space<vmem>>, vector<512x128xbf16>
    %cst_8 = arith.constant dense<0.000000e+00> : vector<8x128xf32>
    %11 = tpu.matmul %9, %10, %cst_8 {dimension_numbers = #tpu.dot_dimension_numbers<[1], [0], [0], [1], [0, 0, 1, 1], [], []>} : vector<8x512xbf16>, vector<512x128xbf16>, vector<8x128xf32> -> vector<8x128xf32>
    %c0_9 = arith.constant 0 : index
    %c0_10 = arith.constant 0 : index
    %12 = vector.load %arg6[%c0_9, %c0_10] : memref<1x128xf32, #tpu.memory_space<vmem>>, vector<1x128xf32>
    %13 = vector.broadcast %12 : vector<1x128xf32> to vector<8x128xf32>
    %14 = arith.addf %11, %13 : vector<8x128xf32>
    %15 = vector.extract_strided_slice %14 {offsets = [0, 0], sizes = [8, 20], strides = [1, 1]} : vector<8x128xf32> to vector<8x20xf32>
    %16 = vector.extract_strided_slice %14 {offsets = [0, 20], sizes = [8, 20], strides = [1, 1]} : vector<8x128xf32> to vector<8x20xf32>
    %c0_11 = arith.constant 0 : index
    %c0_12 = arith.constant 0 : index
    %17 = vector.load %arg2[%c0_11, %c0_12] : memref<8x20xf32, #tpu.memory_space<vmem>>, vector<8x20xf32>
    %cst_13 = arith.constant 5.000000e-01 : f32
    %18 = vector.broadcast %cst_13 : f32 to vector<8x20xf32>
    %19 = arith.mulf %18, %16 : vector<8x20xf32>
    %20 = math.exp %19 : vector<8x20xf32>
    %21 = arith.mulf %17, %20 : vector<8x20xf32>
    %22 = arith.addf %15, %21 : vector<8x20xf32>
    %23 = arith.truncf %22 : vector<8x20xf32> to vector<8x20xbf16>
    %c0_14 = arith.constant 0 : index
    %c0_15 = arith.constant 0 : index
    %24 = vector.load %arg7[%c0_14, %c0_15] : memref<20x512xbf16, #tpu.memory_space<vmem>>, vector<20x512xbf16>
    %cst_16 = arith.constant dense<0.000000e+00> : vector<8x512xf32>
    %25 = tpu.matmul %23, %24, %cst_16 {dimension_numbers = #tpu.dot_dimension_numbers<[1], [0], [0], [1], [0, 0, 1, 1], [], []>} : vector<8x20xbf16>, vector<20x512xbf16>, vector<8x512xf32> -> vector<8x512xf32>
    %c0_17 = arith.constant 0 : index
    %c0_18 = arith.constant 0 : index
    %26 = vector.load %arg8[%c0_17, %c0_18] : memref<1x512xf32, #tpu.memory_space<vmem>>, vector<1x512xf32>
    %27 = vector.broadcast %26 : vector<1x512xf32> to vector<8x512xf32>
    %28 = arith.addf %25, %27 : vector<8x512xf32>
    %cst_19 = arith.constant 0.000000e+00 : f32
    %29 = vector.broadcast %cst_19 : f32 to vector<8x512xf32>
    %30 = arith.maximumf %28, %29 : vector<8x512xf32>
    %31 = arith.truncf %30 : vector<8x512xf32> to vector<8x512xbf16>
    %c0_20 = arith.constant 0 : index
    %c0_21 = arith.constant 0 : index
    %32 = vector.load %arg9[%c0_20, %c0_21] : memref<512x896xbf16, #tpu.memory_space<vmem>>, vector<512x896xbf16>
    %cst_22 = arith.constant dense<0.000000e+00> : vector<8x896xf32>
    %33 = tpu.matmul %31, %32, %cst_22 {dimension_numbers = #tpu.dot_dimension_numbers<[1], [0], [0], [1], [0, 0, 1, 1], [], []>} : vector<8x512xbf16>, vector<512x896xbf16>, vector<8x896xf32> -> vector<8x896xf32>
    %c0_23 = arith.constant 0 : index
    %c0_24 = arith.constant 0 : index
    %34 = vector.load %arg10[%c0_23, %c0_24] : memref<1x896xf32, #tpu.memory_space<vmem>>, vector<1x896xf32>
    %35 = vector.broadcast %34 : vector<1x896xf32> to vector<8x896xf32>
    %36 = arith.addf %33, %35 : vector<8x896xf32>
    %37 = arith.negf %36 : vector<8x896xf32>
    %38 = math.exp %37 : vector<8x896xf32>
    %cst_25 = arith.constant 1.000000e+00 : f32
    %39 = vector.broadcast %cst_25 : f32 to vector<8x896xf32>
    %40 = arith.addf %39, %38 : vector<8x896xf32>
    %41 = arith.divf %39, %40 : vector<8x896xf32>
    %c0_26 = arith.constant 0 : index
    %c0_27 = arith.constant 0 : index
    %42 = vector.load %arg11[%c0_26, %c0_27] : memref<8x896xf32, #tpu.memory_space<vmem>>, vector<8x896xf32>
    tpu.vector_store %arg11[%c0_26, %c0_27], %41 {strides = array<i32>} : memref<8x896xf32, #tpu.memory_space<vmem>>, vector<8x896xf32>,
    %c0_28 = arith.constant 0 : index
    %c0_29 = arith.constant 0 : index
    %43 = vector.load %arg12[%c0_28, %c0_29] : memref<8x128xf32, #tpu.memory_space<vmem>>, vector<8x128xf32>
    tpu.vector_store %arg12[%c0_28, %c0_29], %14 {strides = array<i32>} : memref<8x128xf32, #tpu.memory_space<vmem>>, vector<8x128xf32>,
    return
  }
  func.func @transform_0(%arg0: i32) -> (i32, i32) {
    %c0_i32 = arith.constant 0 : i32
    %c0_i32_0 = arith.constant 0 : i32
    return %arg0, %c0_i32 : i32, i32
  }
  func.func @transform_1(%arg0: i32) -> (i32, i32) {
    %c0_i32 = arith.constant 0 : i32
    %c0_i32_0 = arith.constant 0 : i32
    return %arg0, %c0_i32 : i32, i32
  }
  func.func @transform_2(%arg0: i32) -> (i32, i32) {
    %c0_i32 = arith.constant 0 : i32
    %c0_i32_0 = arith.constant 0 : i32
    %c0_i32_1 = arith.constant 0 : i32
    return %c0_i32, %c0_i32_0 : i32, i32
  }
  func.func @transform_3(%arg0: i32) -> (i32, i32) {
    %c0_i32 = arith.constant 0 : i32
    %c0_i32_0 = arith.constant 0 : i32
    %c0_i32_1 = arith.constant 0 : i32
    return %c0_i32, %c0_i32_0 : i32, i32
  }
  func.func @transform_4(%arg0: i32) -> (i32, i32) {
    %c0_i32 = arith.constant 0 : i32
    %c0_i32_0 = arith.constant 0 : i32
    %c0_i32_1 = arith.constant 0 : i32
    return %c0_i32, %c0_i32_0 : i32, i32
  }
  func.func @transform_5(%arg0: i32) -> (i32, i32) {
    %c0_i32 = arith.constant 0 : i32
    %c0_i32_0 = arith.constant 0 : i32
    %c0_i32_1 = arith.constant 0 : i32
    return %c0_i32, %c0_i32_0 : i32, i32
  }
  func.func @transform_6(%arg0: i32) -> (i32, i32) {
    %c0_i32 = arith.constant 0 : i32
    %c0_i32_0 = arith.constant 0 : i32
    %c0_i32_1 = arith.constant 0 : i32
    return %c0_i32, %c0_i32_0 : i32, i32
  }
  func.func @transform_7(%arg0: i32) -> (i32, i32) {
    %c0_i32 = arith.constant 0 : i32
    %c0_i32_0 = arith.constant 0 : i32
    %c0_i32_1 = arith.constant 0 : i32
    return %c0_i32, %c0_i32_0 : i32, i32
  }
  func.func @transform_8(%arg0: i32) -> (i32, i32) {
    %c0_i32 = arith.constant 0 : i32
    %c0_i32_0 = arith.constant 0 : i32
    %c0_i32_1 = arith.constant 0 : i32
    return %c0_i32, %c0_i32_0 : i32, i32
  }
  func.func @transform_9(%arg0: i32) -> (i32, i32) {
    %c0_i32 = arith.constant 0 : i32
    %c0_i32_0 = arith.constant 0 : i32
    %c0_i32_1 = arith.constant 0 : i32
    return %c0_i32, %c0_i32_0 : i32, i32
  }
  func.func @transform_10(%arg0: i32) -> (i32, i32) {
    %c0_i32 = arith.constant 0 : i32
    %c0_i32_0 = arith.constant 0 : i32
    return %arg0, %c0_i32 : i32, i32
  }
  func.func @transform_11(%arg0: i32) -> (i32, i32) {
    %c0_i32 = arith.constant 0 : i32
    %c0_i32_0 = arith.constant 0 : i32
    return %arg0, %c0_i32 : i32, i32
  }
}

</mosaic_0001>

<bundles_post_ra>
// kernel: tpu_custom_call.1
= control target key start
LH: loop header
LB: loop body
LE: loop exit
PB: predicated region body
PF: predicated region fallthrough
CT: control target
= control target key end

     0   :  { %17 = vsyncpa [#allocation3], 0  ;;  %s6072_s0 = inlined_call_operand.hbm [shape: f32[8,896], index: 0, kind: input, shape index: {}]   ;;  %s6073_s1 = inlined_call_operand.hbm [shape: f32[8,20], index: 1, kind: input, shape index: {}]   ;;  %s6074_s2 = inlined_call_operand.hbm [shape: bf16[896,512], index: 2, kind: input, shape index: {}]   ;;  %s6075_s3 = inlined_call_operand.vmem [shape: f32[1,512], index: 3, kind: input, shape index: {}]   ;;  %s6076_s4 = inlined_call_operand.hbm [shape: bf16[512,128], index: 4, kind: input, shape index: {}]   ;;  %s6077_s5 = inlined_call_operand.vmem [shape: f32[1,128], index: 5, kind: input, shape index: {}]   ;;  %s6078_s6 = inlined_call_operand.hbm [shape: bf16[20,512], index: 6, kind: input, shape index: {}]   ;;  %s6079_s7 = inlined_call_operand.vmem [shape: f32[1,512], index: 7, kind: input, shape index: {}]   ;;  %s6080_s8 = inlined_call_operand.hbm [shape: bf16[512,896], index: 8, kind: input, shape index: {}]   ;;  %s6081_s9 = inlined_call_operand.vmem [shape: f32[1,896], index: 9, kind: input, shape index: {}]   ;;  %s6082_s10 = inlined_call_operand.hbm [shape: f32[8,896], index: 10, kind: output, shape index: {0}]   ;;  %s6083_s11 = inlined_call_operand.hbm [shape: f32[8,128], index: 11, kind: output, shape index: {1}]  }
   0x1   :  { %18 = vsyncpa [#allocation6], 0 }
   0x2   :  { %19 = vsyncpa [#allocation9], 0 }
   0x3   :  { %20 = vsyncpa [#allocation12], 0 }
   0x4   :  { %21 = vsyncpa [#allocation4], 0 }
   0x5   :  { %22 = vsyncpa [#allocation15], 0  ;;  %s5770_s17 = smov [#allocation5]   ;;  %s5771_s19 = smov [#allocation8]  }
   0x6   :  { %s39_s18 = sshll.u32 %s5770_s17, 4  ;;  %s62_s20 = sshll.u32 %s5771_s19, 4  ;;  %s40_s18 = int_to_ptr.vmem [resolvable:$true] %s39_s18  ;;  %s5846_s20 = int_to_ptr.vmem [resolvable:$true] %s62_s20 }
   0x7   :  { %s5582_s23 = scalar_lea.hbm %s6073_s1, 128 }
   0x8   :  { %p5583_p0 = scmp.ne.s32.totalorder %s6073_s1, %s5582_s23  ;;  %p5586_p1 = scmp.lt.u32.totalorder %s5582_s23, %s6073_s1 }
   0xa   :  { %p5588_p2 = pnand %p5586_p1, %p5583_p0 }
   0xc   :  { %5591 = shalt.err (!%p5588_p2)
}
   0xd   :  { %s5592_s28 = scalar_lea.vmem %s40_s18, 128  ;;  %p5597_p4 = scmp.lt.s32.totalorder %s40_s18, %s40_s18 }
   0xe   :  { %p5593_p3 = scmp.ne.s32.totalorder %s40_s18, %s5592_s28  ;;  %p5598_p5 = scmp.lt.s32.totalorder %s5592_s28, %s5592_s28 }
  0x10   :  { %p5599_p6 = por %p5598_p5, %p5597_p4 }
  0x12   :  { %p5600_p7 = pnand %p5599_p6, %p5593_p3 }
  0x14   :  { %5603 = shalt.err (!%p5600_p7)
}
  0x15   :  { %42 = dma.hbm_to_vmem [thread:$0]  %s6073_s1, 128, %s40_s18, [#allocation6]  }
  0x16   :  { %s5604_s14 = scalar_lea.hbm %s6076_s4, 4096 }
  0x17   :  { %p5605_p8 = scmp.ne.s32.totalorder %s6076_s4, %s5604_s14  ;;  %p5608_p9 = scmp.lt.u32.totalorder %s5604_s14, %s6076_s4 }
  0x19   :  { %p5610_p10 = pnand %p5608_p9, %p5605_p8 }
  0x1b   :  { %5613 = shalt.err (!%p5610_p10)
}
  0x1c   :  { %s5614_s21 = scalar_lea.vmem %s5846_s20, 4096  ;;  %p5619_p12 = scmp.lt.s32.totalorder %s5846_s20, %s5846_s20 }
  0x1d   :  { %p5615_p11 = scmp.ne.s32.totalorder %s5846_s20, %s5614_s21  ;;  %p5620_p13 = scmp.lt.s32.totalorder %s5614_s21, %s5614_s21 }
  0x1f   :  { %p5621_p0 = por %p5620_p13, %p5619_p12 }
  0x21   :  { %p5622_p1 = pnand %p5621_p0, %p5615_p11 }
  0x23   :  { %5625 = shalt.err (!%p5622_p1)
}
  0x24   :  { %s5772_s1 = smov 64   ;;  %s5773_s18 = smov 4  }
  0x25   :  { %68 = dma.hbm_to_vmem [thread:$0]  %s6076_s4, 4096, %s5846_s20, [#allocation9], %s5772_s1, %s5772_s1, %s5773_s18  }
  0x26   :  { %s5774_s24 = smov [#allocation2]   ;;  %s5775_s26 = smov [#allocation7]  }
  0x27   :  { %s29_s25 = sshll.u32 %s5774_s24, 4  ;;  %s48_s27 = sshll.u32 %s5775_s26, 4  ;;  %s30_s25 = int_to_ptr.vmem [resolvable:$true] %s29_s25  ;;  %s5877_s27 = int_to_ptr.vmem [resolvable:$true] %s48_s27 }
  0x28   :  { %s5626_s30 = scalar_lea.hbm %s6072_s0, 896 }
  0x29   :  { %p5627_p2 = scmp.ne.s32.totalorder %s6072_s0, %s5626_s30  ;;  %p5630_p3 = scmp.lt.u32.totalorder %s5626_s30, %s6072_s0 }
  0x2b   :  { %p5632_p4 = pnand %p5630_p3, %p5627_p2 }
  0x2d   :  { %5635 = shalt.err (!%p5632_p4)
}
  0x2e   :  { %s5636_s4 = scalar_lea.vmem %s30_s25, 896  ;;  %p5641_p6 = scmp.lt.s32.totalorder %s30_s25, %s30_s25 }
  0x2f   :  { %p5637_p5 = scmp.ne.s32.totalorder %s30_s25, %s5636_s4  ;;  %p5642_p7 = scmp.lt.s32.totalorder %s5636_s4, %s5636_s4 }
  0x31   :  { %p5643_p8 = por %p5642_p7, %p5641_p6 }
  0x33   :  { %p5644_p9 = pnand %p5643_p8, %p5637_p5 }
  0x35   :  { %5647 = shalt.err (!%p5644_p9)
}
  0x36   :  { %32 = dma.hbm_to_vmem [thread:$0]  %s6072_s0, 896, %s30_s25, [#allocation3]  }
  0x37   :  { %s5648_s21 = scalar_lea.hbm %s6074_s2, 28672 }
  0x38   :  { %p5649_p10 = scmp.ne.s32.totalorder %s6074_s2, %s5648_s21  ;;  %p5652_p11 = scmp.lt.u32.totalorder %s5648_s21, %s6074_s2 }
  0x3a   :  { %p5654_p12 = pnand %p5652_p11, %p5649_p10 }
  0x3c   :  { %5657 = shalt.err (!%p5654_p12)
}
  0x3d   :  { %s5658_s24 = scalar_lea.vmem %s5877_s27, 28672  ;;  %p5663_p0 = scmp.lt.s32.totalorder %s5877_s27, %s5877_s27 }
  0x3e   :  { %p5659_p13 = scmp.ne.s32.totalorder %s5877_s27, %s5658_s24  ;;  %p5664_p1 = scmp.lt.s32.totalorder %s5658_s24, %s5658_s24 }
  0x40   :  { %p5665_p2 = por %p5664_p1, %p5663_p0 }
  0x42   :  { %p5666_p3 = pnand %p5665_p2, %p5659_p13 }
  0x44   :  { %5669 = shalt.err (!%p5666_p3)
}
  0x45   :  { %s5776_s0 = smov 256   ;;  %s5777_s25 = smov 16  }
  0x46   :  { %54 = dma.hbm_to_vmem [thread:$0]  %s6074_s2, 28672, %s5877_s27, [#allocation6], %s5776_s0, %s5776_s0, %s5777_s25  }
  0x47   :  { %s5778_s29 = smov [#allocation10]   ;;  %s5779_s12 = smov [#allocation11]  }
  0x48   :  { %s76_s30 = sshll.u32 %s5778_s29, 4  ;;  %s90_s13 = sshll.u32 %s5779_s12, 4  ;;  %s77_s30 = int_to_ptr.vmem [resolvable:$true] %s76_s30  ;;  %s5908_s13 = int_to_ptr.vmem [resolvable:$true] %s90_s13 }
  0x49   :  { %s5670_s4 = scalar_lea.hbm %s6078_s6, 768 }
  0x4a   :  { %p5671_p4 = scmp.ne.s32.totalorder %s6078_s6, %s5670_s4  ;;  %p5674_p5 = scmp.lt.u32.totalorder %s5670_s4, %s6078_s6 }
  0x4c   :  { %p5676_p6 = pnand %p5674_p5, %p5671_p4 }
  0x4e   :  { %5679 = shalt.err (!%p5676_p6)
}
  0x4f   :  { %s5680_s2 = scalar_lea.vmem %s77_s30, 768  ;;  %p5685_p8 = scmp.lt.s32.totalorder %s77_s30, %s77_s30 }
  0x50   :  { %p5681_p7 = scmp.ne.s32.totalorder %s77_s30, %s5680_s2  ;;  %p5686_p9 = scmp.lt.s32.totalorder %s5680_s2, %s5680_s2 }
  0x52   :  { %p5687_p10 = por %p5686_p9, %p5685_p8 }
  0x54   :  { %p5688_p11 = pnand %p5687_p10, %p5681_p7 }
  0x56   :  { %5691 = shalt.err (!%p5688_p11)
}
  0x57   :  { %82 = dma.hbm_to_vmem [thread:$0]  %s6078_s6, 768, %s77_s30, [#allocation9], %s5776_s0, %s5776_s0, %s5777_s25  }
  0x58   :  { %s5692_s22 = scalar_lea.hbm %s6080_s8, 28672 }
  0x59   :  { %p5693_p12 = scmp.ne.s32.totalorder %s6080_s8, %s5692_s22  ;;  %p5696_p13 = scmp.lt.u32.totalorder %s5692_s22, %s6080_s8 }
  0x5b   :  { %p5698_p0 = pnand %p5696_p13, %p5693_p12 }
  0x5d   :  { %5701 = shalt.err (!%p5698_p0)
}
  0x5e   :  { %s5702_s29 = scalar_lea.vmem %s5908_s13, 28672  ;;  %p5707_p2 = scmp.lt.s32.totalorder %s5908_s13, %s5908_s13 }
  0x5f   :  { %p5703_p1 = scmp.ne.s32.totalorder %s5908_s13, %s5702_s29  ;;  %p5708_p3 = scmp.lt.s32.totalorder %s5702_s29, %s5702_s29 }
  0x61   :  { %p5709_p4 = por %p5708_p3, %p5707_p2 }
  0x63   :  { %p5710_p5 = pnand %p5709_p4, %p5703_p1 }
  0x65   :  { %5713 = shalt.err (!%p5710_p5)
}
  0x66   :  { %s5780_s6 = smov 448   ;;  %s5781_s0 = smov 28  }
  0x67   :  { %96 = dma.hbm_to_vmem [thread:$0]  %s6080_s8, 28672, %s5908_s13, [#allocation12], %s5780_s6, %s5780_s6, %s5781_s0  }
  0x68   :  { %5758 = dma.done.wait [#allocation3], 896  }
  0x69   :  { %5759 = vsyncadd [#allocation3], 4294966400 }
  0x6a   :  { %5760 = dma.done.wait [#allocation6], 28800  }
  0x6b   :  { %5761 = vsyncadd [#allocation6], 4294938496 }
  0x6c   :  { %5762 = dma.done.wait [#allocation9], 4864  }
  0x6d   :  { %5763 = vsyncadd [#allocation9], 4294962432 }
  0x6e   :  { %5764 = dma.done.wait [#allocation12], 28672  }
  0x6f   :  { %5765 = vsyncadd [#allocation12], 4294938624  ;;  %v5782_v0 = vmov 0   ;;  %v4854_v1 = vld [vmem:[#allocation7 + $0x4] ss:$16 sps:$4 sm:$0xff]   ;;  %v119_v49 = vld [vmem:[#allocation2 + $0x8] sm:$0xff] }
  0x70   :  { %1653 = vmatprep.mubr.bf16.mxu1 %v5782_v0  ;;  %v4856_v2 = vld [vmem:[#allocation7 + $0x604] ss:$16 sps:$4 sm:$0xff]   ;;  %1498 = vmatprep.subr.bf16.mxu0 %v4854_v1  ;;  %v4858_v3 = vld [vmem:[#allocation7] ss:$16 sps:$4 sm:$0xff]   ;;  %v4906_v35 = vld [vmem:[#allocation7 + $0xc] ss:$16 sps:$4 sm:$0xff]   ;;  %v126_v52 = vpack.c.bf16 %v119_v49, %v119_v49 }
  0x71   :  { %v4859_v4 = vld [vmem:[#allocation7 + $0x600] ss:$16 sps:$4 sm:$0xff]   ;;  %1621 = vmatprep.subr.bf16.mxu1 %v4856_v2  ;;  %v4860_v5 = vld [vmem:[#allocation7 + $0x24] ss:$16 sps:$4 sm:$0xff]   ;;  %1499 = vmatpush1.bf16.msra.mxu0 %v4858_v3  ;;  %v4904_v37 = vld [vmem:[#allocation7 + $0x8] ss:$16 sps:$4 sm:$0xff]  }
  0x72   :  { %1622 = vmatpush1.bf16.msra.mxu1 %v4859_v4  ;;  %v4862_v6 = vld [vmem:[#allocation7 + $0x624] ss:$16 sps:$4 sm:$0xff]   ;;  %v4864_v7 = vld [vmem:[#allocation7 + $0x20] ss:$16 sps:$4 sm:$0xff]   ;;  %1500 = vmatprep.subr.bf16.mxu0 %v4860_v5  ;;  %v4912_v40 = vld [vmem:[#allocation7 + $0x2c] ss:$16 sps:$4 sm:$0xff]  }
  0x73   :  { %v4865_v8 = vld [vmem:[#allocation7 + $0x620] ss:$16 sps:$4 sm:$0xff]   ;;  %1623 = vmatprep.subr.bf16.mxu1 %v4862_v6  ;;  %v4866_v9 = vld [vmem:[#allocation7 + $0x44] ss:$16 sps:$4 sm:$0xff]   ;;  %v4910_v41 = vld [vmem:[#allocation7 + $0x28] ss:$16 sps:$4 sm:$0xff]   ;;  %1530 = vmatprep.mubr.bf16.mxu0 %v126_v52 }
  0x74   :  { %v4868_v10 = vld [vmem:[#allocation7 + $0x644] ss:$16 sps:$4 sm:$0xff]   ;;  %v4870_v11 = vld [vmem:[#allocation7 + $0x40] ss:$16 sps:$4 sm:$0xff]   ;;  %v4918_v44 = vld [vmem:[#allocation7 + $0x4c] ss:$16 sps:$4 sm:$0xff]  }
  0x75   :  { %v4871_v12 = vld [vmem:[#allocation7 + $0x640] ss:$16 sps:$4 sm:$0xff]   ;;  %1501 = vmatpush1.bf16.msra.mxu0 %v4864_v7  ;;  %v4872_v13 = vld [vmem:[#allocation7 + $0x64] ss:$16 sps:$4 sm:$0xff]   ;;  %v4916_v45 = vld [vmem:[#allocation7 + $0x48] ss:$16 sps:$4 sm:$0xff]  }
  0x76   :  { %1624 = vmatpush1.bf16.msra.mxu1 %v4865_v8  ;;  %1502 = vmatprep.subr.bf16.mxu0 %v4866_v9  ;;  %v4874_v14 = vld [vmem:[#allocation7 + $0x664] ss:$16 sps:$4 sm:$0xff]   ;;  %v4876_v15 = vld [vmem:[#allocation7 + $0x60] ss:$16 sps:$4 sm:$0xff]   ;;  %v4924_v48 = vld [vmem:[#allocation7 + $0x6c] ss:$16 sps:$4 sm:$0xff]  }
  0x77   :  { %1625 = vmatprep.subr.bf16.mxu1 %v4868_v10  ;;  %v4877_v16 = vld [vmem:[#allocation7 + $0x660] ss:$16 sps:$4 sm:$0xff]   ;;  %v4878_v17 = vld [vmem:[#allocation7 + $0x84] ss:$16 sps:$4 sm:$0xff]   ;;  %v4922_v50 = vld [vmem:[#allocation7 + $0x68] ss:$16 sps:$4 sm:$0xff]  }
  0x78   :  { %v4880_v18 = vld [vmem:[#allocation7 + $0x684] ss:$16 sps:$4 sm:$0xff]   ;;  %v4882_v19 = vld [vmem:[#allocation7 + $0x80] ss:$16 sps:$4 sm:$0xff]   ;;  %v4930_v54 = vld [vmem:[#allocation7 + $0x8c] ss:$16 sps:$4 sm:$0xff]  }
  0x79   :  { %1503 = vmatpush1.bf16.msra.mxu0 %v4870_v11  ;;  %v4883_v20 = vld [vmem:[#allocation7 + $0x680] ss:$16 sps:$4 sm:$0xff]   ;;  %v4884_v21 = vld [vmem:[#allocation7 + $0xa4] ss:$16 sps:$4 sm:$0xff]   ;;  %v4928_v55 = vld [vmem:[#allocation7 + $0x88] ss:$16 sps:$4 sm:$0xff]  }
  0x7a   :  { %1626 = vmatpush1.bf16.msra.mxu1 %v4871_v12  ;;  %1504 = vmatprep.subr.bf16.mxu0 %v4872_v13  ;;  %v4886_v22 = vld [vmem:[#allocation7 + $0x6a4] ss:$16 sps:$4 sm:$0xff]   ;;  %v4888_v23 = vld [vmem:[#allocation7 + $0xa0] ss:$16 sps:$4 sm:$0xff]   ;;  %v4936_v58 = vld [vmem:[#allocation7 + $0xac] ss:$16 sps:$4 sm:$0xff]  }
  0x7b   :  { %1627 = vmatprep.subr.bf16.mxu1 %v4874_v14  ;;  %v4889_v24 = vld [vmem:[#allocation7 + $0x6a0] ss:$16 sps:$4 sm:$0xff]   ;;  %v4890_v25 = vld [vmem:[#allocation7 + $0xc4] ss:$16 sps:$4 sm:$0xff]   ;;  %v4934_v59 = vld [vmem:[#allocation7 + $0xa8] ss:$16 sps:$4 sm:$0xff]  }
  0x7c   :  { %v4892_v26 = vld [vmem:[#allocation7 + $0x6c4] ss:$16 sps:$4 sm:$0xff]   ;;  %v4894_v27 = vld [vmem:[#allocation7 + $0xc0] ss:$16 sps:$4 sm:$0xff]   ;;  %v4942_v62 = vld [vmem:[#allocation7 + $0xcc] ss:$16 sps:$4 sm:$0xff]  }
  0x7d   :  { %1505 = vmatpush1.bf16.msra.mxu0 %v4876_v15  ;;  %v4895_v28 = vld [vmem:[#allocation7 + $0x6c0] ss:$16 sps:$4 sm:$0xff]   ;;  %v4896_v29 = vld [vmem:[#allocation7 + $0xe4] ss:$16 sps:$4 sm:$0xff]   ;;  %v4940_v63 = vld [vmem:[#allocation7 + $0xc8] ss:$16 sps:$4 sm:$0xff]  }
  0x7e   :  { %1628 = vmatpush1.bf16.msra.mxu1 %v4877_v16  ;;  %1506 = vmatprep.subr.bf16.mxu0 %v4878_v17  ;;  %v4898_v30 = vld [vmem:[#allocation7 + $0x6e4] ss:$16 sps:$4 sm:$0xff]   ;;  %v4900_v31 = vld [vmem:[#allocation7 + $0xe0] ss:$16 sps:$4 sm:$0xff]   ;;  %v4948_v3 = vld [vmem:[#allocation7 + $0xec] ss:$16 sps:$4 sm:$0xff]  }
  0x7f   :  { %1629 = vmatprep.subr.bf16.mxu1 %v4880_v18  ;;  %v4901_v32 = vld [vmem:[#allocation7 + $0x6e0] ss:$16 sps:$4 sm:$0xff]   ;;  %v4902_v34 = vld [vmem:[#allocation7 + $0x104] ss:$16 sps:$4 sm:$0xff]   ;;  %v4946_v4 = vld [vmem:[#allocation7 + $0xe8] ss:$16 sps:$4 sm:$0xff]  }
  0x80   :  { %v124_v33 = vld [vmem:[#allocation2 + $0x30] sm:$0xff]  ;;  %v118_v7 = vld [vmem:[#allocation2] sm:$0xff]  ;;  %v4955_v8 = vld [vmem:[#allocation7 + $0x10c] ss:$16 sps:$4 sm:$0xff]   ;;  %vm2250_vm0 = vcmask 1041408   ;;  %vm2246_vm1 = vcmask 162816  }
  0x81   :  { %1507 = vmatpush1.bf16.msra.mxu0 %v4882_v19  ;;  %v5940_v36 = vpack.c.bf16 %v124_v33, %v124_v33  ;;  %v4907_v38 = vld [vmem:[#allocation7 + $0x100] ss:$16 sps:$4 sm:$0xff]   ;;  %v4908_v39 = vld [vmem:[#allocation7 + $0x124] ss:$16 sps:$4 sm:$0xff]   ;;  %v5943_v10 = vpack.c.bf16 %v118_v7, %v118_v7  ;;  %v4953_v11 = vld [vmem:[#allocation7 + $0x108] ss:$16 sps:$4 sm:$0xff]  }
  0x82   :  { %1630 = vmatpush1.bf16.msra.mxu1 %v4883_v20  ;;  %1508 = vmatprep.subr.bf16.mxu0 %v4884_v21  ;;  %v4913_v42 = vld [vmem:[#allocation7 + $0x120] ss:$16 sps:$4 sm:$0xff]   ;;  %v4914_v43 = vld [vmem:[#allocation7 + $0x144] ss:$16 sps:$4 sm:$0xff]   ;;  %v4961_v13 = vld [vmem:[#allocation7 + $0x12c] ss:$16 sps:$4 sm:$0xff]  }
  0x83   :  { %1631 = vmatprep.subr.bf16.mxu1 %v4886_v22  ;;  %v4919_v46 = vld [vmem:[#allocation7 + $0x140] ss:$16 sps:$4 sm:$0xff]   ;;  %v4920_v47 = vld [vmem:[#allocation7 + $0x164] ss:$16 sps:$4 sm:$0xff]   ;;  %v4959_v15 = vld [vmem:[#allocation7 + $0x128] ss:$16 sps:$4 sm:$0xff]  }
  0x84   :  { %v4925_v51 = vld [vmem:[#allocation7 + $0x160] ss:$16 sps:$4 sm:$0xff]   ;;  %v4926_v53 = vld [vmem:[#allocation7 + $0x184] ss:$16 sps:$4 sm:$0xff]   ;;  %v4967_v17 = vld [vmem:[#allocation7 + $0x14c] ss:$16 sps:$4 sm:$0xff]  }
  0x85   :  { %1509 = vmatpush1.bf16.msra.mxu0 %v4888_v23  ;;  %v4931_v56 = vld [vmem:[#allocation7 + $0x180] ss:$16 sps:$4 sm:$0xff]   ;;  %v4932_v57 = vld [vmem:[#allocation7 + $0x1a4] ss:$16 sps:$4 sm:$0xff]   ;;  %v4965_v19 = vld [vmem:[#allocation7 + $0x148] ss:$16 sps:$4 sm:$0xff]  }
  0x86   :  { %1632 = vmatpush1.bf16.msra.mxu1 %v4889_v24  ;;  %1510 = vmatprep.subr.bf16.mxu0 %v4890_v25  ;;  %v4937_v60 = vld [vmem:[#allocation7 + $0x1a0] ss:$16 sps:$4 sm:$0xff]   ;;  %v4938_v61 = vld [vmem:[#allocation7 + $0x1c4] ss:$16 sps:$4 sm:$0xff]   ;;  %v4973_v21 = vld [vmem:[#allocation7 + $0x16c] ss:$16 sps:$4 sm:$0xff]  }
  0x87   :  { %1633 = vmatprep.subr.bf16.mxu1 %v4892_v26  ;;  %v4943_v1 = vld [vmem:[#allocation7 + $0x1c0] ss:$16 sps:$4 sm:$0xff]   ;;  %v4944_v2 = vld [vmem:[#allocation7 + $0x1e4] ss:$16 sps:$4 sm:$0xff]   ;;  %v4971_v23 = vld [vmem:[#allocation7 + $0x168] ss:$16 sps:$4 sm:$0xff]  }
  0x88   :  { %v4949_v5 = vld [vmem:[#allocation7 + $0x1e0] ss:$16 sps:$4 sm:$0xff]   ;;  %v4952_v6 = vld [vmem:[#allocation7 + $0x204] ss:$16 sps:$4 sm:$0xff]   ;;  %v4979_v25 = vld [vmem:[#allocation7 + $0x18c] ss:$16 sps:$4 sm:$0xff]  }
  0x89   :  { %1511 = vmatpush1.bf16.msra.mxu0 %v4894_v27  ;;  %v4950_v9 = vld [vmem:[#allocation7 + $0x200] ss:$16 sps:$4 sm:$0xff]   ;;  %v4958_v12 = vld [vmem:[#allocation7 + $0x224] ss:$16 sps:$4 sm:$0xff]   ;;  %v4977_v27 = vld [vmem:[#allocation7 + $0x188] ss:$16 sps:$4 sm:$0xff]  }
  0x8a   :  { %1634 = vmatpush1.bf16.msra.mxu1 %v4895_v28  ;;  %1512 = vmatprep.subr.bf16.mxu0 %v4896_v29  ;;  %v4956_v14 = vld [vmem:[#allocation7 + $0x220] ss:$16 sps:$4 sm:$0xff]   ;;  %v4964_v16 = vld [vmem:[#allocation7 + $0x244] ss:$16 sps:$4 sm:$0xff]   ;;  %v4985_v29 = vld [vmem:[#allocation7 + $0x1ac] ss:$16 sps:$4 sm:$0xff]  }
  0x8b   :  { %1635 = vmatprep.subr.bf16.mxu1 %v4898_v30  ;;  %v4962_v18 = vld [vmem:[#allocation7 + $0x240] ss:$16 sps:$4 sm:$0xff]   ;;  %v4970_v20 = vld [vmem:[#allocation7 + $0x264] ss:$16 sps:$4 sm:$0xff]   ;;  %v4991_v33 = vld [vmem:[#allocation7 + $0x1cc] ss:$16 sps:$4 sm:$0xff]  }
  0x8c   :  { %v4968_v22 = vld [vmem:[#allocation7 + $0x260] ss:$16 sps:$4 sm:$0xff]   ;;  %v4976_v24 = vld [vmem:[#allocation7 + $0x284] ss:$16 sps:$4 sm:$0xff]   ;;  %v5037_v7 = vld [vmem:[#allocation7 + $0x2c8] ss:$16 sps:$4 sm:$0xff]  }
  0x8d   :  { %1513 = vmatpush1.bf16.msra.mxu0 %v4900_v31  ;;  %v4974_v26 = vld [vmem:[#allocation7 + $0x280] ss:$16 sps:$4 sm:$0xff]   ;;  %v4982_v28 = vld [vmem:[#allocation7 + $0x2a4] ss:$16 sps:$4 sm:$0xff]   ;;  %v4983_v31 = vld [vmem:[#allocation7 + $0x1a8] ss:$16 sps:$4 sm:$0xff]  }
  0x8e   :  { %1636 = vmatpush1.bf16.msra.mxu1 %v4901_v32  ;;  %1514 = vmatprep.subr.bf16.mxu0 %v4902_v34  ;;  %v4980_v30 = vld [vmem:[#allocation7 + $0x2a0] ss:$16 sps:$4 sm:$0xff]   ;;  %v4988_v32 = vld [vmem:[#allocation7 + $0x2c4] ss:$16 sps:$4 sm:$0xff]   ;;  %v121_v34 = vld [vmem:[#allocation2 + $0x18] sm:$0xff] }
  0x8f   :  { %1662 = vmatprep.subr.bf16.mxu1 %v4906_v35  ;;  %v4986_v35 = vld [vmem:[#allocation7 + $0x2c0] ss:$16 sps:$4 sm:$0xff]  }
  0x90   :  { %v5004_v49 = vld [vmem:[#allocation7 + $0x320] ss:$16 sps:$4 sm:$0xff]  }
  0x91   :  { %1654 = vmatmul.mubr.bf16.vlgmr.msra.gmra.mrb[0].mxu1 %v5940_v36  ;;  %1515 = vmatpush1.bf16.msra.mxu0 %v4907_v38  ;;  %v4989_v38 = vld [vmem:[#allocation7 + $0x1c8] ss:$16 sps:$4 sm:$0xff]  }
  0x92   :  { %1663 = vmatpush1.bf16.msra.mxu1 %v4904_v37  ;;  %1516 = vmatprep.subr.bf16.mxu0 %v4908_v39  ;;  %v128_v37 = vpack.c.bf16 %v121_v34, %v121_v34  ;;  %v4994_v39 = vld [vmem:[#allocation7 + $0x2e4] ss:$16 sps:$4 sm:$0xff]   ;;  %v5070_v34 = vld [vmem:[#allocation7 + $0x480] ss:$16 sps:$4 sm:$0xff]  }
  0x93   :  { %1664 = vmatprep.subr.bf16.mxu1 %v4912_v40  ;;  %1694 = vmatprep.mubr.bf16.mxu1 %v126_v52  ;;  %v4997_v40 = vld [vmem:[#allocation7 + $0x1ec] ss:$16 sps:$4 sm:$0xff]  }
  0x94   :  { %v5015_v52 = vld [vmem:[#allocation7 + $0x24c] ss:$16 sps:$4 sm:$0xff]  }
  0x95   :  { %1517 = vmatpush1.bf16.msra.mxu0 %v4913_v42  ;;  %v4995_v42 = vld [vmem:[#allocation7 + $0x1e8] ss:$16 sps:$4 sm:$0xff]  }
  0x96   :  { %1665 = vmatpush1.bf16.msra.mxu1 %v4910_v41  ;;  %1518 = vmatprep.subr.bf16.mxu0 %v4914_v43  ;;  %v4992_v41 = vld [vmem:[#allocation7 + $0x2e0] ss:$16 sps:$4 sm:$0xff]   ;;  %v5000_v43 = vld [vmem:[#allocation7 + $0x304] ss:$16 sps:$4 sm:$0xff]  }
  0x97   :  { %1666 = vmatprep.subr.bf16.mxu1 %v4918_v44  ;;  %v5003_v44 = vld [vmem:[#allocation7 + $0x20c] ss:$16 sps:$4 sm:$0xff]  }
  0x99   :  { %1519 = vmatpush1.bf16.msra.mxu0 %v4919_v46  ;;  %v5001_v46 = vld [vmem:[#allocation7 + $0x208] ss:$16 sps:$4 sm:$0xff]  }
  0x9a   :  { %1667 = vmatpush1.bf16.msra.mxu1 %v4916_v45  ;;  %1520 = vmatprep.subr.bf16.mxu0 %v4920_v47  ;;  %v4998_v45 = vld [vmem:[#allocation7 + $0x300] ss:$16 sps:$4 sm:$0xff]   ;;  %v5006_v47 = vld [vmem:[#allocation7 + $0x324] ss:$16 sps:$4 sm:$0xff]  }
  0x9b   :  { %1668 = vmatprep.subr.bf16.mxu1 %v4924_v48  ;;  %v5009_v48 = vld [vmem:[#allocation7 + $0x22c] ss:$16 sps:$4 sm:$0xff]  }
  0x9d   :  { %1521 = vmatpush1.bf16.msra.mxu0 %v4925_v51  ;;  %v5012_v51 = vld [vmem:[#allocation7 + $0x344] ss:$16 sps:$4 sm:$0xff]  }
  0x9e   :  { %1669 = vmatpush1.bf16.msra.mxu1 %v4922_v50  ;;  %1522 = vmatprep.subr.bf16.mxu0 %v4926_v53  ;;  %v5007_v50 = vld [vmem:[#allocation7 + $0x228] ss:$16 sps:$4 sm:$0xff]   ;;  %v5010_v53 = vld [vmem:[#allocation7 + $0x340] ss:$16 sps:$4 sm:$0xff]  }
  0x9f   :  { %1670 = vmatprep.subr.bf16.mxu1 %v4930_v54  ;;  %v5013_v54 = vld [vmem:[#allocation7 + $0x248] ss:$16 sps:$4 sm:$0xff]  }
  0xa1   :  { %1523 = vmatpush1.bf16.msra.mxu0 %v4931_v56  ;;  %v5021_v56 = vld [vmem:[#allocation7 + $0x26c] ss:$16 sps:$4 sm:$0xff]  }
  0xa2   :  { %1671 = vmatpush1.bf16.msra.mxu1 %v4928_v55  ;;  %1524 = vmatprep.subr.bf16.mxu0 %v4932_v57  ;;  %v5018_v55 = vld [vmem:[#allocation7 + $0x364] ss:$16 sps:$4 sm:$0xff]   ;;  %v5016_v57 = vld [vmem:[#allocation7 + $0x360] ss:$16 sps:$4 sm:$0xff]  }
  0xa3   :  { %1672 = vmatprep.subr.bf16.mxu1 %v4936_v58  ;;  %v5019_v58 = vld [vmem:[#allocation7 + $0x268] ss:$16 sps:$4 sm:$0xff]  }
  0xa5   :  { %1525 = vmatpush1.bf16.msra.mxu0 %v4937_v60  ;;  %v5027_v60 = vld [vmem:[#allocation7 + $0x28c] ss:$16 sps:$4 sm:$0xff]  }
  0xa6   :  { %1673 = vmatpush1.bf16.msra.mxu1 %v4934_v59  ;;  %1526 = vmatprep.subr.bf16.mxu0 %v4938_v61  ;;  %v5024_v59 = vld [vmem:[#allocation7 + $0x384] ss:$16 sps:$4 sm:$0xff]   ;;  %v5022_v61 = vld [vmem:[#allocation7 + $0x380] ss:$16 sps:$4 sm:$0xff]  }
  0xa7   :  { %1674 = vmatprep.subr.bf16.mxu1 %v4942_v62  ;;  %v5025_v62 = vld [vmem:[#allocation7 + $0x288] ss:$16 sps:$4 sm:$0xff]  }
  0xa9   :  { %1527 = vmatpush1.bf16.msra.mxu0 %v4943_v1  ;;  %v5033_v1 = vld [vmem:[#allocation7 + $0x2ac] ss:$16 sps:$4 sm:$0xff]  }
  0xaa   :  { %1675 = vmatpush1.bf16.msra.mxu1 %v4940_v63  ;;  %1528 = vmatprep.subr.bf16.mxu0 %v4944_v2  ;;  %v5030_v63 = vld [vmem:[#allocation7 + $0x3a4] ss:$16 sps:$4 sm:$0xff]   ;;  %v5028_v2 = vld [vmem:[#allocation7 + $0x3a0] ss:$16 sps:$4 sm:$0xff]  }
  0xab   :  { %1676 = vmatprep.subr.bf16.mxu1 %v4948_v3  ;;  %v5031_v3 = vld [vmem:[#allocation7 + $0x2a8] ss:$16 sps:$4 sm:$0xff]  }
  0xad   :  { %1529 = vmatpush1.bf16.msra.mxu0 %v4949_v5  ;;  %v5039_v5 = vld [vmem:[#allocation7 + $0x2cc] ss:$16 sps:$4 sm:$0xff]  }
  0xae   :  { %1677 = vmatpush1.bf16.msra.mxu1 %v4946_v4  ;;  %1539 = vmatprep.subr.bf16.mxu0 %v4952_v6  ;;  %v5036_v4 = vld [vmem:[#allocation7 + $0x3c4] ss:$16 sps:$4 sm:$0xff]   ;;  %v5034_v6 = vld [vmem:[#allocation7 + $0x3c0] ss:$16 sps:$4 sm:$0xff]  }
  0xaf   :  { %1678 = vmatprep.subr.bf16.mxu1 %v4955_v8  ;;  %v5042_v8 = vld [vmem:[#allocation7 + $0x3e4] ss:$16 sps:$4 sm:$0xff]  }
  0xb0   :  { %1531 = vmatmul.mubr.bf16.vlgmr.msra.gmra.mrb[0].mxu0 %v5943_v10 }
  0xb1   :  { %1540 = vmatpush1.bf16.msra.mxu0 %v4950_v9  ;;  %1571 = vmatprep.mubr.bf16.mxu0 %v128_v37  ;;  %v5045_v9 = vld [vmem:[#allocation7 + $0x2ec] ss:$16 sps:$4 sm:$0xff]  }
  0xb2   :  { %1679 = vmatpush1.bf16.msra.mxu1 %v4953_v11  ;;  %1541 = vmatprep.subr.bf16.mxu0 %v4958_v12  ;;  %v5043_v11 = vld [vmem:[#allocation7 + $0x2e8] ss:$16 sps:$4 sm:$0xff]   ;;  %v120_v12 = vld [vmem:[#allocation2 + $0x10] sm:$0xff] }
  0xb3   :  { %1680 = vmatprep.subr.bf16.mxu1 %v4961_v13  ;;  %v5048_v13 = vld [vmem:[#allocation7 + $0x404] ss:$16 sps:$4 sm:$0xff]  }
  0xb5   :  { %1542 = vmatpush1.bf16.msra.mxu0 %v4956_v14  ;;  %v5051_v14 = vld [vmem:[#allocation7 + $0x30c] ss:$16 sps:$4 sm:$0xff]  }
  0xb6   :  { %1681 = vmatpush1.bf16.msra.mxu1 %v4959_v15  ;;  %1543 = vmatprep.subr.bf16.mxu0 %v4964_v16  ;;  %v5046_v15 = vld [vmem:[#allocation7 + $0x400] ss:$16 sps:$4 sm:$0xff]   ;;  %v5947_v16 = vpack.c.bf16 %v120_v12, %v120_v12 }
  0xb7   :  { %1682 = vmatprep.subr.bf16.mxu1 %v4967_v17  ;;  %v5049_v17 = vld [vmem:[#allocation7 + $0x308] ss:$16 sps:$4 sm:$0xff]   ;;  %v5130_v12 = vld [vmem:[#allocation7 + $0x5c0] ss:$16 sps:$4 sm:$0xff]  }
  0xb9   :  { %1544 = vmatpush1.bf16.msra.mxu0 %v4962_v18  ;;  %v5054_v18 = vld [vmem:[#allocation7 + $0x424] ss:$16 sps:$4 sm:$0xff]  }
  0xba   :  { %1683 = vmatpush1.bf16.msra.mxu1 %v4965_v19  ;;  %1545 = vmatprep.subr.bf16.mxu0 %v4970_v20  ;;  %v5057_v19 = vld [vmem:[#allocation7 + $0x32c] ss:$16 sps:$4 sm:$0xff]  }
  0xbb   :  { %1684 = vmatprep.subr.bf16.mxu1 %v4973_v21  ;;  %v123_v20 = vld [vmem:[#allocation2 + $0x28] sm:$0xff] }
  0xbc   :  { %v5949_v21 = vpack.c.bf16 %v123_v20, %v123_v20  ;;  %v5190_v20 = vld [vmem:[#allocation8 + $0x40] sm:$0xff]  }
  0xbd   :  { %1546 = vmatpush1.bf16.msra.mxu0 %v4968_v22  ;;  %v5052_v22 = vld [vmem:[#allocation7 + $0x420] ss:$16 sps:$4 sm:$0xff]  }
  0xbe   :  { %1685 = vmatpush1.bf16.msra.mxu1 %v4971_v23  ;;  %1547 = vmatprep.subr.bf16.mxu0 %v4976_v24  ;;  %v5055_v23 = vld [vmem:[#allocation7 + $0x328] ss:$16 sps:$4 sm:$0xff]   ;;  %v5060_v24 = vld [vmem:[#allocation7 + $0x444] ss:$16 sps:$4 sm:$0xff]  }
  0xbf   :  { %1686 = vmatprep.subr.bf16.mxu1 %v4979_v25  ;;  %v5063_v25 = vld [vmem:[#allocation7 + $0x34c] ss:$16 sps:$4 sm:$0xff]  }
  0xc1   :  { %1548 = vmatpush1.bf16.msra.mxu0 %v4974_v26  ;;  %v5058_v26 = vld [vmem:[#allocation7 + $0x440] ss:$16 sps:$4 sm:$0xff]  }
  0xc2   :  { %1687 = vmatpush1.bf16.msra.mxu1 %v4977_v27  ;;  %1549 = vmatprep.subr.bf16.mxu0 %v4982_v28  ;;  %v5061_v27 = vld [vmem:[#allocation7 + $0x348] ss:$16 sps:$4 sm:$0xff]   ;;  %v5066_v28 = vld [vmem:[#allocation7 + $0x464] ss:$16 sps:$4 sm:$0xff]  }
  0xc3   :  { %1688 = vmatprep.subr.bf16.mxu1 %v4985_v29  ;;  %v5069_v29 = vld [vmem:[#allocation7 + $0x36c] ss:$16 sps:$4 sm:$0xff]  }
  0xc5   :  { %1550 = vmatpush1.bf16.msra.mxu0 %v4980_v30  ;;  %v5064_v30 = vld [vmem:[#allocation7 + $0x460] ss:$16 sps:$4 sm:$0xff]  }
  0xc6   :  { %1689 = vmatpush1.bf16.msra.mxu1 %v4983_v31  ;;  %1551 = vmatprep.subr.bf16.mxu0 %v4988_v32  ;;  %v5067_v31 = vld [vmem:[#allocation7 + $0x368] ss:$16 sps:$4 sm:$0xff]   ;;  %v5072_v32 = vld [vmem:[#allocation7 + $0x484] ss:$16 sps:$4 sm:$0xff]  }
  0xc7   :  { %1690 = vmatprep.subr.bf16.mxu1 %v4991_v33  ;;  %v5075_v33 = vld [vmem:[#allocation7 + $0x38c] ss:$16 sps:$4 sm:$0xff]  }
  0xc9   :  { %1552 = vmatpush1.bf16.msra.mxu0 %v4986_v35  ;;  %v5073_v35 = vld [vmem:[#allocation7 + $0x388] ss:$16 sps:$4 sm:$0xff]  }
  0xca   :  { %1691 = vmatpush1.bf16.msra.mxu1 %v4989_v38  ;;  %1553 = vmatprep.subr.bf16.mxu0 %v4994_v39  ;;  %v5081_v38 = vld [vmem:[#allocation7 + $0x3ac] ss:$16 sps:$4 sm:$0xff]   ;;  %v5076_v39 = vld [vmem:[#allocation7 + $0x4a0] ss:$16 sps:$4 sm:$0xff]  }
  0xcb   :  { %1692 = vmatprep.subr.bf16.mxu1 %v4997_v40  ;;  %v5079_v40 = vld [vmem:[#allocation7 + $0x3a8] ss:$16 sps:$4 sm:$0xff]  }
  0xcd   :  { %1554 = vmatpush1.bf16.msra.mxu0 %v4992_v41  ;;  %v5084_v41 = vld [vmem:[#allocation7 + $0x4c4] ss:$16 sps:$4 sm:$0xff]  }
  0xce   :  { %1693 = vmatpush1.bf16.msra.mxu1 %v4995_v42  ;;  %1555 = vmatprep.subr.bf16.mxu0 %v5000_v43  ;;  %v5087_v42 = vld [vmem:[#allocation7 + $0x3cc] ss:$16 sps:$4 sm:$0xff]   ;;  %v5082_v43 = vld [vmem:[#allocation7 + $0x4c0] ss:$16 sps:$4 sm:$0xff]  }
  0xcf   :  { %1703 = vmatprep.subr.bf16.mxu1 %v5003_v44  ;;  %v5085_v44 = vld [vmem:[#allocation7 + $0x3c8] ss:$16 sps:$4 sm:$0xff]  }
  0xd1   :  { %1695 = vmatmul.mubr.bf16.vlgmr.msra.gmra.mrb[4].mxu1 %v5943_v10  ;;  %1556 = vmatpush1.bf16.msra.mxu0 %v4998_v45  ;;  %v5040_v10 = vld [vmem:[#allocation7 + $0x3e0] ss:$16 sps:$4 sm:$0xff]   ;;  %v5090_v45 = vld [vmem:[#allocation7 + $0x4e4] ss:$16 sps:$4 sm:$0xff]  }
  0xd2   :  { %1704 = vmatpush1.bf16.msra.mxu1 %v5001_v46  ;;  %1557 = vmatprep.subr.bf16.mxu0 %v5006_v47  ;;  %v5093_v46 = vld [vmem:[#allocation7 + $0x3ec] ss:$16 sps:$4 sm:$0xff]   ;;  %v5088_v47 = vld [vmem:[#allocation7 + $0x4e0] ss:$16 sps:$4 sm:$0xff]  }
  0xd3   :  { %1705 = vmatprep.subr.bf16.mxu1 %v5009_v48  ;;  %1735 = vmatprep.mubr.bf16.mxu1 %v128_v37  ;;  %v5078_v37 = vld [vmem:[#allocation7 + $0x4a4] ss:$16 sps:$4 sm:$0xff]   ;;  %v5091_v48 = vld [vmem:[#allocation7 + $0x3e8] ss:$16 sps:$4 sm:$0xff]  }
  0xd5   :  { %1558 = vmatpush1.bf16.msra.mxu0 %v5004_v49  ;;  %v5096_v49 = vld [vmem:[#allocation7 + $0x504] ss:$16 sps:$4 sm:$0xff]  }
  0xd6   :  { %1706 = vmatpush1.bf16.msra.mxu1 %v5007_v50  ;;  %1559 = vmatprep.subr.bf16.mxu0 %v5012_v51  ;;  %v5099_v50 = vld [vmem:[#allocation7 + $0x40c] ss:$16 sps:$4 sm:$0xff]   ;;  %v5094_v51 = vld [vmem:[#allocation7 + $0x500] ss:$16 sps:$4 sm:$0xff]  }
  0xd7   :  { %1707 = vmatprep.subr.bf16.mxu1 %v5015_v52  ;;  %v5097_v52 = vld [vmem:[#allocation7 + $0x408] ss:$16 sps:$4 sm:$0xff]  }
  0xd9   :  { %1560 = vmatpush1.bf16.msra.mxu0 %v5010_v53  ;;  %v5102_v53 = vld [vmem:[#allocation7 + $0x524] ss:$16 sps:$4 sm:$0xff]  }
  0xda   :  { %1708 = vmatpush1.bf16.msra.mxu1 %v5013_v54  ;;  %1561 = vmatprep.subr.bf16.mxu0 %v5018_v55  ;;  %v5105_v54 = vld [vmem:[#allocation7 + $0x42c] ss:$16 sps:$4 sm:$0xff]   ;;  %v5100_v55 = vld [vmem:[#allocation7 + $0x520] ss:$16 sps:$4 sm:$0xff]  }
  0xdb   :  { %1709 = vmatprep.subr.bf16.mxu1 %v5021_v56  ;;  %v5103_v56 = vld [vmem:[#allocation7 + $0x428] ss:$16 sps:$4 sm:$0xff]  }
  0xdd   :  { %1562 = vmatpush1.bf16.msra.mxu0 %v5016_v57  ;;  %v5108_v57 = vld [vmem:[#allocation7 + $0x544] ss:$16 sps:$4 sm:$0xff]  }
  0xde   :  { %1710 = vmatpush1.bf16.msra.mxu1 %v5019_v58  ;;  %1563 = vmatprep.subr.bf16.mxu0 %v5024_v59  ;;  %v5111_v58 = vld [vmem:[#allocation7 + $0x44c] ss:$16 sps:$4 sm:$0xff]   ;;  %v5106_v59 = vld [vmem:[#allocation7 + $0x540] ss:$16 sps:$4 sm:$0xff]  }
  0xdf   :  { %1711 = vmatprep.subr.bf16.mxu1 %v5027_v60  ;;  %v5109_v60 = vld [vmem:[#allocation7 + $0x448] ss:$16 sps:$4 sm:$0xff]  }
  0xe1   :  { %1564 = vmatpush1.bf16.msra.mxu0 %v5022_v61  ;;  %v5114_v61 = vld [vmem:[#allocation7 + $0x564] ss:$16 sps:$4 sm:$0xff]  }
  0xe2   :  { %1712 = vmatpush1.bf16.msra.mxu1 %v5025_v62  ;;  %1565 = vmatprep.subr.bf16.mxu0 %v5030_v63  ;;  %v5117_v62 = vld [vmem:[#allocation7 + $0x46c] ss:$16 sps:$4 sm:$0xff]   ;;  %v5112_v63 = vld [vmem:[#allocation7 + $0x560] ss:$16 sps:$4 sm:$0xff]  }
  0xe3   :  { %1713 = vmatprep.subr.bf16.mxu1 %v5033_v1  ;;  %v5115_v1 = vld [vmem:[#allocation7 + $0x468] ss:$16 sps:$4 sm:$0xff]  }
  0xe5   :  { %1566 = vmatpush1.bf16.msra.mxu0 %v5028_v2  ;;  %v5120_v2 = vld [vmem:[#allocation7 + $0x584] ss:$16 sps:$4 sm:$0xff]  }
  0xe6   :  { %1714 = vmatpush1.bf16.msra.mxu1 %v5031_v3  ;;  %1567 = vmatprep.subr.bf16.mxu0 %v5036_v4  ;;  %v5123_v3 = vld [vmem:[#allocation7 + $0x48c] ss:$16 sps:$4 sm:$0xff]   ;;  %v5118_v4 = vld [vmem:[#allocation7 + $0x580] ss:$16 sps:$4 sm:$0xff]  }
  0xe7   :  { %1715 = vmatprep.subr.bf16.mxu1 %v5039_v5  ;;  %v5121_v5 = vld [vmem:[#allocation7 + $0x488] ss:$16 sps:$4 sm:$0xff]  }
  0xe9   :  { %1568 = vmatpush1.bf16.msra.mxu0 %v5034_v6  ;;  %v5126_v6 = vld [vmem:[#allocation7 + $0x5a4] ss:$16 sps:$4 sm:$0xff]  }
  0xea   :  { %1716 = vmatpush1.bf16.msra.mxu1 %v5037_v7  ;;  %1569 = vmatprep.subr.bf16.mxu0 %v5042_v8  ;;  %v5129_v7 = vld [vmem:[#allocation7 + $0x4ac] ss:$16 sps:$4 sm:$0xff]   ;;  %v5124_v8 = vld [vmem:[#allocation7 + $0x5a0] ss:$16 sps:$4 sm:$0xff]  }
  0xeb   :  { %1717 = vmatprep.subr.bf16.mxu1 %v5045_v9  ;;  %v5127_v9 = vld [vmem:[#allocation7 + $0x4a8] ss:$16 sps:$4 sm:$0xff]  }
  0xed   :  { %1570 = vmatpush1.bf16.msra.mxu0 %v5040_v10  ;;  %v5132_v10 = vld [vmem:[#allocation7 + $0x5c4] ss:$16 sps:$4 sm:$0xff]  }
  0xee   :  { %1718 = vmatpush1.bf16.msra.mxu1 %v5043_v11  ;;  %1580 = vmatprep.subr.bf16.mxu0 %v5048_v13  ;;  %v5135_v11 = vld [vmem:[#allocation7 + $0x4cc] ss:$16 sps:$4 sm:$0xff]   ;;  %v5133_v13 = vld [vmem:[#allocation7 + $0x4c8] ss:$16 sps:$4 sm:$0xff]  }
  0xef   :  { %1719 = vmatprep.subr.bf16.mxu1 %v5051_v14  ;;  %v5138_v14 = vld [vmem:[#allocation7 + $0x5e4] ss:$16 sps:$4 sm:$0xff]  }
  0xf0   :  { %1572 = vmatmul.mubr.bf16.vlgmr.msra.gmra.mrb[0].mxu0 %v5947_v16 }
  0xf1   :  { %1581 = vmatpush1.bf16.msra.mxu0 %v5046_v15  ;;  %1612 = vmatprep.mubr.bf16.mxu0 %v5949_v21  ;;  %v5141_v15 = vld [vmem:[#allocation7 + $0x4ec] ss:$16 sps:$4 sm:$0xff]  }
  0xf2   :  { %1720 = vmatpush1.bf16.msra.mxu1 %v5049_v17  ;;  %1582 = vmatprep.subr.bf16.mxu0 %v5054_v18  ;;  %v5139_v17 = vld [vmem:[#allocation7 + $0x4e8] ss:$16 sps:$4 sm:$0xff]   ;;  %v122_v18 = vld [vmem:[#allocation2 + $0x20] sm:$0xff] }
  0xf3   :  { %1721 = vmatprep.subr.bf16.mxu1 %v5057_v19  ;;  %v5144_v19 = vld [vmem:[#allocation7 + $0x50c] ss:$16 sps:$4 sm:$0xff]  }
  0xf5   :  { %1583 = vmatpush1.bf16.msra.mxu0 %v5052_v22  ;;  %v5191_v22 = vld [vmem:[#allocation8] sm:$0xff]  }
  0xf6   :  { %1722 = vmatpush1.bf16.msra.mxu1 %v5055_v23  ;;  %1584 = vmatprep.subr.bf16.mxu0 %v5060_v24  ;;  %v129_v23 = vpack.c.bf16 %v122_v18, %v122_v18  ;;  %v5147_v24 = vld [vmem:[#allocation7 + $0x52c] ss:$16 sps:$4 sm:$0xff]   ;;  %v5215_v18 = vld [vmem:[#allocation8 + $0xa0] sm:$0xff]  }
  0xf7   :  { %1723 = vmatprep.subr.bf16.mxu1 %v5063_v25  ;;  %v5192_v25 = vld [vmem:[#allocation8 + $0x48] sm:$0xff]  }
  0xf9   :  { %1585 = vmatpush1.bf16.msra.mxu0 %v5058_v26  ;;  %v5145_v26 = vld [vmem:[#allocation7 + $0x528] ss:$16 sps:$4 sm:$0xff]  }
  0xfa   :  { %1724 = vmatpush1.bf16.msra.mxu1 %v5061_v27  ;;  %1586 = vmatprep.subr.bf16.mxu0 %v5066_v28  ;;  %v5193_v27 = vld [vmem:[#allocation8 + $0x8] sm:$0xff]  }
  0xfb   :  { %1725 = vmatprep.subr.bf16.mxu1 %v5069_v29  ;;  %v5150_v28 = vld [vmem:[#allocation7 + $0x54c] ss:$16 sps:$4 sm:$0xff]   ;;  %v5194_v29 = vld [vmem:[#allocation8 + $0x50] sm:$0xff]  }
  0xfd   :  { %1587 = vmatpush1.bf16.msra.mxu0 %v5064_v30  ;;  %v5148_v30 = vld [vmem:[#allocation7 + $0x548] ss:$16 sps:$4 sm:$0xff]  }
  0xfe   :  { %1726 = vmatpush1.bf16.msra.mxu1 %v5067_v31  ;;  %1588 = vmatprep.subr.bf16.mxu0 %v5072_v32  ;;  %v5195_v31 = vld [vmem:[#allocation8 + $0x10] sm:$0xff]   ;;  %v5153_v32 = vld [vmem:[#allocation7 + $0x56c] ss:$16 sps:$4 sm:$0xff]  }
  0xff   :  { %1727 = vmatprep.subr.bf16.mxu1 %v5075_v33  ;;  %v5196_v33 = vld [vmem:[#allocation8 + $0x58] sm:$0xff]  }
 0x101   :  { %1589 = vmatpush1.bf16.msra.mxu0 %v5070_v34  ;;  %v5151_v34 = vld [vmem:[#allocation7 + $0x568] ss:$16 sps:$4 sm:$0xff]  }
 0x102   :  { %1728 = vmatpush1.bf16.msra.mxu1 %v5073_v35  ;;  %1590 = vmatprep.subr.bf16.mxu0 %v5078_v37  ;;  %v5197_v35 = vld [vmem:[#allocation8 + $0x18] sm:$0xff]  }
 0x103   :  { %1729 = vmatprep.subr.bf16.mxu1 %v5081_v38  ;;  %v5156_v37 = vld [vmem:[#allocation7 + $0x58c] ss:$16 sps:$4 sm:$0xff]   ;;  %v5198_v38 = vld [vmem:[#allocation8 + $0x60] sm:$0xff]  }
 0x105   :  { %1591 = vmatpush1.bf16.msra.mxu0 %v5076_v39  ;;  %v5154_v39 = vld [vmem:[#allocation7 + $0x588] ss:$16 sps:$4 sm:$0xff]  }
 0x106   :  { %1730 = vmatpush1.bf16.msra.mxu1 %v5079_v40  ;;  %1592 = vmatprep.subr.bf16.mxu0 %v5084_v41  ;;  %v5199_v40 = vld [vmem:[#allocation8 + $0x20] sm:$0xff]   ;;  %v5159_v41 = vld [vmem:[#allocation7 + $0x5ac] ss:$16 sps:$4 sm:$0xff]  }
 0x107   :  { %1731 = vmatprep.subr.bf16.mxu1 %v5087_v42  ;;  %v5200_v42 = vld [vmem:[#allocation8 + $0x68] sm:$0xff]  }
 0x109   :  { %1593 = vmatpush1.bf16.msra.mxu0 %v5082_v43  ;;  %v5157_v43 = vld [vmem:[#allocation7 + $0x5a8] ss:$16 sps:$4 sm:$0xff]  }
 0x10a   :  { %1732 = vmatpush1.bf16.msra.mxu1 %v5085_v44  ;;  %1594 = vmatprep.subr.bf16.mxu0 %v5090_v45  ;;  %v5162_v44 = vld [vmem:[#allocation7 + $0x5cc] ss:$16 sps:$4 sm:$0xff]   ;;  %v5160_v45 = vld [vmem:[#allocation7 + $0x5c8] ss:$16 sps:$4 sm:$0xff]  }
 0x10b   :  { %1733 = vmatprep.subr.bf16.mxu1 %v5093_v46  ;;  %v5165_v46 = vld [vmem:[#allocation7 + $0x5ec] ss:$16 sps:$4 sm:$0xff]  }
 0x10d   :  { %1595 = vmatpush1.bf16.msra.mxu0 %v5088_v47  ;;  %v5163_v47 = vld [vmem:[#allocation7 + $0x5e8] ss:$16 sps:$4 sm:$0xff]  }
 0x10e   :  { %1734 = vmatpush1.bf16.msra.mxu1 %v5091_v48  ;;  %1596 = vmatprep.subr.bf16.mxu0 %v5096_v49  ;;  %v5168_v48 = vld [vmem:[#allocation7 + $0x60c] ss:$16 sps:$4 sm:$0xff]   ;;  %v5166_v49 = vld [vmem:[#allocation7 + $0x608] ss:$16 sps:$4 sm:$0xff]  }
 0x10f   :  { %1744 = vmatprep.subr.bf16.mxu1 %v5099_v50  ;;  %v5171_v50 = vld [vmem:[#allocation7 + $0x62c] ss:$16 sps:$4 sm:$0xff]  }
 0x111   :  { %1736 = vmatmul.mubr.bf16.vlgmr.msra.gmra.mrb[4].mxu1 %v5947_v16  ;;  %1597 = vmatpush1.bf16.msra.mxu0 %v5094_v51  ;;  %v5136_v16 = vld [vmem:[#allocation7 + $0x5e0] ss:$16 sps:$4 sm:$0xff]   ;;  %v5169_v51 = vld [vmem:[#allocation7 + $0x628] ss:$16 sps:$4 sm:$0xff]  }
 0x112   :  { %1745 = vmatpush1.bf16.msra.mxu1 %v5097_v52  ;;  %1598 = vmatprep.subr.bf16.mxu0 %v5102_v53  ;;  %v5174_v52 = vld [vmem:[#allocation7 + $0x64c] ss:$16 sps:$4 sm:$0xff]   ;;  %v5172_v53 = vld [vmem:[#allocation7 + $0x648] ss:$16 sps:$4 sm:$0xff]  }
 0x113   :  { %1746 = vmatprep.subr.bf16.mxu1 %v5105_v54  ;;  %1776 = vmatprep.mubr.bf16.mxu1 %v5949_v21  ;;  %v5142_v21 = vld [vmem:[#allocation7 + $0x508] ss:$16 sps:$4 sm:$0xff]   ;;  %v5177_v54 = vld [vmem:[#allocation7 + $0x66c] ss:$16 sps:$4 sm:$0xff]  }
 0x115   :  { %1599 = vmatpush1.bf16.msra.mxu0 %v5100_v55  ;;  %v5175_v55 = vld [vmem:[#allocation7 + $0x668] ss:$16 sps:$4 sm:$0xff]  }
 0x116   :  { %1747 = vmatpush1.bf16.msra.mxu1 %v5103_v56  ;;  %1600 = vmatprep.subr.bf16.mxu0 %v5108_v57  ;;  %v5180_v56 = vld [vmem:[#allocation7 + $0x68c] ss:$16 sps:$4 sm:$0xff]   ;;  %v5178_v57 = vld [vmem:[#allocation7 + $0x688] ss:$16 sps:$4 sm:$0xff]  }
 0x117   :  { %1748 = vmatprep.subr.bf16.mxu1 %v5111_v58  ;;  %v5183_v58 = vld [vmem:[#allocation7 + $0x6ac] ss:$16 sps:$4 sm:$0xff]  }
 0x119   :  { %1601 = vmatpush1.bf16.msra.mxu0 %v5106_v59  ;;  %v5181_v59 = vld [vmem:[#allocation7 + $0x6a8] ss:$16 sps:$4 sm:$0xff]  }
 0x11a   :  { %1749 = vmatpush1.bf16.msra.mxu1 %v5109_v60  ;;  %1602 = vmatprep.subr.bf16.mxu0 %v5114_v61  ;;  %v5186_v60 = vld [vmem:[#allocation7 + $0x6cc] ss:$16 sps:$4 sm:$0xff]  }
 0x11b   :  { %1750 = vmatprep.subr.bf16.mxu1 %v5117_v62  ;;  %v5184_v62 = vld [vmem:[#allocation7 + $0x6c8] ss:$16 sps:$4 sm:$0xff]  }
 0x11d   :  { %1603 = vmatpush1.bf16.msra.mxu0 %v5112_v63 }
 0x11e   :  { %1751 = vmatpush1.bf16.msra.mxu1 %v5115_v1  ;;  %1604 = vmatprep.subr.bf16.mxu0 %v5120_v2  ;;  %v5189_v1 = vld [vmem:[#allocation7 + $0x6ec] ss:$16 sps:$4 sm:$0xff]  }
 0x11f   :  { %1752 = vmatprep.subr.bf16.mxu1 %v5123_v3 }
 0x121   :  { %1605 = vmatpush1.bf16.msra.mxu0 %v5118_v4  ;;  %v5187_v4 = vld [vmem:[#allocation7 + $0x6e8] ss:$16 sps:$4 sm:$0xff]  }
 0x122   :  { %1753 = vmatpush1.bf16.msra.mxu1 %v5121_v5  ;;  %1606 = vmatprep.subr.bf16.mxu0 %v5126_v6  ;;  %v5201_v5 = vld [vmem:[#allocation8 + $0x28] sm:$0xff]   ;;  %v5202_v6 = vld [vmem:[#allocation8 + $0x70] sm:$0xff]  }
 0x123   :  { %1754 = vmatprep.subr.bf16.mxu1 %v5129_v7  ;;  %v5203_v7 = vld [vmem:[#allocation8 + $0x30] sm:$0xff]  }
 0x125   :  { %1607 = vmatpush1.bf16.msra.mxu0 %v5124_v8  ;;  %v5204_v8 = vld [vmem:[#allocation8 + $0x78] sm:$0xff]  }
 0x126   :  { %1755 = vmatpush1.bf16.msra.mxu1 %v5127_v9  ;;  %1608 = vmatprep.subr.bf16.mxu0 %v5132_v10  ;;  %v5205_v9 = vld [vmem:[#allocation8 + $0x38] sm:$0xff]   ;;  %v5206_v10 = vld [vmem:[#allocation8 + $0xc0] sm:$0xff]  }
 0x127   :  { %1756 = vmatprep.subr.bf16.mxu1 %v5135_v11  ;;  %v5207_v11 = vld [vmem:[#allocation8 + $0x80] sm:$0xff]  }
 0x129   :  { %1609 = vmatpush1.bf16.msra.mxu0 %v5130_v12  ;;  %v5208_v12 = vld [vmem:[#allocation8 + $0xc8] sm:$0xff]  }
 0x12a   :  { %1757 = vmatpush1.bf16.msra.mxu1 %v5133_v13  ;;  %1610 = vmatprep.subr.bf16.mxu0 %v5138_v14  ;;  %v5209_v13 = vld [vmem:[#allocation8 + $0x88] sm:$0xff]   ;;  %v5210_v14 = vld [vmem:[#allocation8 + $0xd0] sm:$0xff]  }
 0x12b   :  { %1758 = vmatprep.subr.bf16.mxu1 %v5141_v15  ;;  %v5212_v15 = vld [vmem:[#allocation8 + $0xd8] sm:$0xff]  }
 0x12d   :  { %1611 = vmatpush1.bf16.msra.mxu0 %v5136_v16  ;;  %v5213_v16 = vld [vmem:[#allocation8 + $0x98] sm:$0xff]  }
 0x12e   :  { %1759 = vmatpush1.bf16.msra.mxu1 %v5139_v17  ;;  %4706 = vmatprep.subr.bf16.mxu0 %v5190_v20  ;;  %v5214_v17 = vld [vmem:[#allocation8 + $0xe0] sm:$0xff]   ;;  %v5217_v20 = vld [vmem:[#allocation8 + $0xa8] sm:$0xff]  }
 0x12f   :  { %1760 = vmatprep.subr.bf16.mxu1 %v5144_v19  ;;  %v5216_v19 = vld [vmem:[#allocation8 + $0xe8] sm:$0xff]  }
 0x130   :  { %1613 = vmatmul.mubr.bf16.vlgmr.msra.gmra.mrb[0].mxu0 %v129_v23 }
 0x131   :  { %4707 = vmatpush3.bf16.msra.mxu0 %v5191_v22  ;;  %v5219_v22 = vld [vmem:[#allocation8 + $0xb0] sm:$0xff]  }
 0x132   :  { %1761 = vmatpush1.bf16.msra.mxu1 %v5142_v21  ;;  %4708 = vmatprep.subr.bf16.mxu0 %v5192_v25  ;;  %v5218_v21 = vld [vmem:[#allocation8 + $0xf0] sm:$0xff]   ;;  %v358_v25 = vlaneseq }
 0x133   :  { %1762 = vmatprep.subr.bf16.mxu1 %v5147_v24  ;;  %v5221_v24 = vld [vmem:[#allocation8 + $0xb8] sm:$0xff]  }
 0x135   :  { %4709 = vmatpush3.bf16.msra.mxu0 %v5193_v27 }
 0x136   :  { %1763 = vmatpush1.bf16.msra.mxu1 %v5145_v26  ;;  %4710 = vmatprep.subr.bf16.mxu0 %v5194_v29  ;;  %v5961_v26 = vshrl.u32 %v358_v25, 7 }
 0x137   :  { %1764 = vmatprep.subr.bf16.mxu1 %v5150_v28  ;;  %v356_v28 = vld [vmem:[%s6075_s3] sm:$0xf] }
 0x138   :  { %v5964_v27 = vsub.s32 0, %v5961_v26  ;;  %v5970_v29 = vsub.s32 1, %v5961_v26 }
 0x139   :  { %4711 = vmatpush3.bf16.msra.mxu0 %v5195_v31 }
 0x13a   :  { %1765 = vmatpush1.bf16.msra.mxu1 %v5148_v30  ;;  %4712 = vmatprep.subr.bf16.mxu0 %v5196_v33  ;;  %v361_v30 = vrot.slane %v356_v28, %v5964_v27  ;;  %v365_v31 = vrot.slane %v356_v28, %v5970_v29 }
 0x13b   :  { %1766 = vmatprep.subr.bf16.mxu1 %v5153_v32 }
 0x13d   :  { %4713 = vmatpush3.bf16.msra.mxu0 %v5197_v35 }
 0x13e   :  { %1767 = vmatpush1.bf16.msra.mxu1 %v5151_v34  ;;  %4714 = vmatprep.subr.bf16.mxu0 %v5198_v38 }
 0x13f   :  { %1768 = vmatprep.subr.bf16.mxu1 %v5156_v37 }
 0x141   :  { %4715 = vmatpush3.bf16.msra.mxu0 %v5199_v40 }
 0x142   :  { %1769 = vmatpush1.bf16.msra.mxu1 %v5154_v39  ;;  %4716 = vmatprep.subr.bf16.mxu0 %v5200_v42 }
 0x143   :  { %1770 = vmatprep.subr.bf16.mxu1 %v5159_v41 }
 0x145   :  { %4717 = vmatpush3.bf16.msra.mxu0 %v5201_v5  ;;  %v4430_v5 = vld [vmem:[%s6077_s5] ss:$0 sm:$0xff]  ;;  %s5783_s5 = smov 108  }
 0x146   :  { %1771 = vmatpush1.bf16.msra.mxu1 %v5157_v43  ;;  %4718 = vmatprep.subr.bf16.mxu0 %v5202_v6 }
 0x147   :  { %1772 = vmatprep.subr.bf16.mxu1 %v5162_v44 }
 0x149   :  { %4719 = vmatpush3.bf16.msra.mxu0 %v5203_v7 }
 0x14a   :  { %1773 = vmatpush1.bf16.msra.mxu1 %v5160_v45  ;;  %4720 = vmatprep.subr.bf16.mxu0 %v5204_v8  ;;  %v5978_v45 = vsub.s32 2, %v5961_v26 }
 0x14b   :  { %1774 = vmatprep.subr.bf16.mxu1 %v5165_v46  ;;  %v5981_v46 = vsub.s32 3, %v5961_v26 }
 0x14d   :  { %4721 = vmatpush3.bf16.msra.mxu0 %v5205_v9 }
 0x14e   :  { %1775 = vmatpush1.bf16.msra.mxu1 %v5163_v47  ;;  %v369_v47 = vrot.slane %v356_v28, %v5978_v45 }
 0x14f   :  { %1785 = vmatprep.subr.bf16.mxu1 %v5168_v48  ;;  %v373_v48 = vrot.slane %v356_v28, %v5981_v46 }
 0x151   :  { %1777 = vmatmul.mubr.bf16.vlgmr.msra.gmra.mrb[4].mxu1 %v129_v23  ;;  %v5220_v23 = vld [vmem:[#allocation8 + $0xf8] sm:$0xff]  }
 0x152   :  { %1786 = vmatpush1.bf16.msra.mxu1 %v5166_v49  ;;  %1817 = vmatprep.mubr.bf16.mxu1 %v5782_v0 }
 0x153   :  { %1787 = vmatprep.subr.bf16.mxu1 %v5171_v50 }
 0x156   :  { %1788 = vmatpush1.bf16.msra.mxu1 %v5169_v51 }
 0x157   :  { %1789 = vmatprep.subr.bf16.mxu1 %v5174_v52 }
 0x15a   :  { %1790 = vmatpush1.bf16.msra.mxu1 %v5172_v53 }
 0x15b   :  { %1791 = vmatprep.subr.bf16.mxu1 %v5177_v54 }
 0x15e   :  { %1792 = vmatpush1.bf16.msra.mxu1 %v5175_v55 }
 0x15f   :  { %1793 = vmatprep.subr.bf16.mxu1 %v5180_v56 }
 0x162   :  { %1794 = vmatpush1.bf16.msra.mxu1 %v5178_v57 }
 0x163   :  { %1795 = vmatprep.subr.bf16.mxu1 %v5183_v58 }
 0x164   :  { %v5956_v61 = vpop.f32.mrb[0].mxu1 }
 0x165   :  { %v5958_v63 = vpop.f32.mrb[1].mxu1 }
 0x166   :  { %v1659_v2 = vpop.f32.mrb[2].mxu1  ;;  %1796 = vmatpush1.bf16.msra.mxu1 %v5181_v59  ;;  %v5222_v59 = vld [vmem:[#allocation10] ss:$16 sps:$4 sm:$0xff]  }
 0x167   :  { %v1660_v3 = vpop.f32.mrb[3].mxu1  ;;  %1797 = vmatprep.subr.bf16.mxu1 %v5186_v60  ;;  %v5224_v60 = vld [vmem:[#allocation10 + $0x4] ss:$16 sps:$4 sm:$0xff]  }
 0x168   :  { %2263 = vmatprep.subr.bf16.mxu0 %v5224_v60  ;;  %v5271_v60 = vld [vmem:[#allocation11 + $0x158] ss:$28 sps:$4 sm:$0xff]  }
 0x16a   :  { %1798 = vmatpush1.bf16.msra.mxu1 %v5184_v62  ;;  %v5227_v62 = vld [vmem:[#allocation10 + $0xc] ss:$16 sps:$4 sm:$0xff]  }
 0x16b   :  { %1799 = vmatprep.subr.bf16.mxu1 %v5189_v1 }
 0x16e   :  { %1800 = vmatpush1.bf16.msra.mxu1 %v5187_v4 }
 0x16f   :  { %4728 = vmatprep.subr.bf16.mxu1 %v5206_v10 }
 0x171   :  { %1818 = vmatmul.mubr.bf16.vlgmr.msra.gmra.mrb[4].mxu1 %v5940_v36  ;;  %v5211_v36 = vld [vmem:[#allocation8 + $0x90] sm:$0xff]  }
 0x172   :  { %4729 = vmatpush3.bf16.msra.mxu1 %v5207_v11 }
 0x173   :  { %4730 = vmatprep.subr.bf16.mxu1 %v5208_v12 }
 0x176   :  { %4731 = vmatpush3.bf16.msra.mxu1 %v5209_v13  ;;  %v2192_v13 = vld [vmem:[#allocation10 + $0x20] sm:$0x33] }
 0x177   :  { %4732 = vmatprep.subr.bf16.mxu1 %v5210_v14  ;;  %v2193_v14 = vld [vmem:[#allocation10 + $0x28] sm:$0x33] }
 0x17a   :  { %4733 = vmatpush3.bf16.msra.mxu1 %v5211_v36 }
 0x17b   :  { %4734 = vmatprep.subr.bf16.mxu1 %v5212_v15  ;;  %v4468_v15 = vcombine.high %v2192_v13, %v2192_v13 }
 0x17e   :  { %4735 = vmatpush3.bf16.msra.mxu1 %v5213_v16  ;;  %v4467_v16 = vcombine.low %v2192_v13, %v2192_v13  ;;  %v5300_v13 = vld [vmem:[#allocation11 + $0x26c] ss:$28 sps:$4 sm:$0xff]  }
 0x17f   :  { %4736 = vmatprep.subr.bf16.mxu1 %v5214_v17  ;;  %v4470_v17 = vcombine.high %v2193_v14, %v2193_v14 }
 0x182   :  { %4737 = vmatpush3.bf16.msra.mxu1 %v5215_v18  ;;  %v4469_v18 = vcombine.low %v2193_v14, %v2193_v14  ;;  %v5303_v14 = vld [vmem:[#allocation11 + $0x274] ss:$28 sps:$4 sm:$0xff]  }
 0x183   :  { %4738 = vmatprep.subr.bf16.mxu1 %v5216_v19  ;;  %v2252_v19 = vsel %vm2250_vm0, %v4467_v16, 0  ;;  %v5306_v16 = vld [vmem:[#allocation11 + $0x2a4] ss:$28 sps:$4 sm:$0xff]  }
 0x186   :  { %4739 = vmatpush3.bf16.msra.mxu1 %v5217_v20  ;;  %v2258_v20 = vsel %vm2250_vm0, %v4469_v18, 0  ;;  %v5304_v18 = vld [vmem:[#allocation11 + $0x2a0] ss:$28 sps:$4 sm:$0xff]  }
 0x187   :  { %4740 = vmatprep.subr.bf16.mxu1 %v5218_v21  ;;  %v5234_v21 = vld [vmem:[#allocation11 + $0x4] ss:$28 sps:$4 sm:$0xff]  }
 0x18a   :  { %4741 = vmatpush3.bf16.msra.mxu1 %v5219_v22  ;;  %v5237_v22 = vld [vmem:[#allocation11 + $0xc] ss:$28 sps:$4 sm:$0xff]  }
 0x18b   :  { %4742 = vmatprep.subr.bf16.mxu1 %v5220_v23 }
 0x18e   :  { %4743 = vmatpush3.bf16.msra.mxu1 %v5221_v24  ;;  %v2177_v24 = vld [vmem:[#allocation5] sm:$0xff] }
 0x18f   :  { %2304 = vmatprep.subr.bf16.mxu1 %v5227_v62  ;;  %v5279_v62 = vld [vmem:[#allocation11 + $0x194] ss:$28 sps:$4 sm:$0xff]  }
 0x203   :  { %v1614_v32 = vpop.f32.mrb[0].mxu0 }
 0x204   :  { %v4794_v33 = vadd.f32 %v1614_v32, %v361_v30  ;;  %v1616_v34 = vpop.f32.mrb[1].mxu0  ;;  %v5235_v32 = vld [vmem:[#allocation11 + $0x8] ss:$28 sps:$4 sm:$0xff]  }
 0x205   :  { %v4796_v35 = vadd.f32 %v1616_v34, %v365_v31  ;;  %v1618_v37 = vpop.f32.mrb[2].mxu0  ;;  %v5232_v31 = vld [vmem:[#allocation11] ss:$28 sps:$4 sm:$0xff]  }
 0x206   :  { %v4795_v38 = vadd.f32 %v4794_v33, %v5956_v61  ;;  %v1619_v39 = vpop.f32.mrb[3].mxu0  ;;  %v5225_v61 = vld [vmem:[#allocation10 + $0x8] ss:$16 sps:$4 sm:$0xff]  }
 0x207   :  { %v4797_v40 = vadd.f32 %v4796_v35, %v5958_v63  ;;  %v5240_v34 = vld [vmem:[#allocation11 + $0x3c] ss:$28 sps:$4 sm:$0xff]   ;;  %v5243_v35 = vld [vmem:[#allocation11 + $0x44] ss:$28 sps:$4 sm:$0xff]   ;;  %v5246_v39 = vld [vmem:[#allocation11 + $0x74] ss:$28 sps:$4 sm:$0xff]  }
 0x208   :  { %v1826_v41 = vmax.f32 %v4795_v38, 0.0  ;;  %v5238_v37 = vld [vmem:[#allocation11 + $0x38] ss:$28 sps:$4 sm:$0xff]   ;;  %v5241_v38 = vld [vmem:[#allocation11 + $0x40] ss:$28 sps:$4 sm:$0xff]  }
 0x209   :  { %v1827_v42 = vmax.f32 %v4797_v40, 0.0  ;;  %v5249_v40 = vld [vmem:[#allocation11 + $0x7c] ss:$28 sps:$4 sm:$0xff]  }
 0x20a   :  { %v1830_v44 = vpack.c.bf16 %v1826_v41, %v1826_v41  ;;  %v5244_v41 = vld [vmem:[#allocation11 + $0x70] ss:$28 sps:$4 sm:$0xff]  }
 0x20b   :  { %v1831_v43 = vpack.c.bf16 %v1827_v42, %v1827_v42  ;;  %v5247_v42 = vld [vmem:[#allocation11 + $0x78] ss:$28 sps:$4 sm:$0xff]  }
 0x20d   :  { %2129 = vmatprep.mubr.bf16.mxu0 %v1831_v43  ;;  %v5252_v43 = vld [vmem:[#allocation11 + $0xac] ss:$28 sps:$4 sm:$0xff]  }
 0x20e   :  { %2130 = vmatmul.mubr.bf16.vlgmr.msra.gmra.mrb[4].mxu0 %v1830_v44  ;;  %v5255_v44 = vld [vmem:[#allocation11 + $0xb4] ss:$28 sps:$4 sm:$0xff]  }
 0x20f   :  { %2295 = vmatprep.mubr.bf16.mxu0 %v5782_v0  ;;  %2264 = vmatpush1.bf16.msra.mxu0 %v5222_v59  ;;  %v5268_v59 = vld [vmem:[#allocation11 + $0x150] ss:$28 sps:$4 sm:$0xff]  }
 0x210   :  { %4471 = vmatprep.subr.msk.bf16.mxu0 %vm2250_vm0, %v4468_v15  ;;  %v5301_v15 = vld [vmem:[#allocation11 + $0x270] ss:$28 sps:$4 sm:$0xff]  }
 0x213   :  { %2266 = vmatpush1.bf16.msra.mxu0 %v2252_v19  ;;  %v5307_v19 = vld [vmem:[#allocation11 + $0x2a8] ss:$28 sps:$4 sm:$0xff]  }
 0x214   :  { %3798 = vmatprep.subr.bf16.mxu0 %v5234_v21  ;;  %v5315_v21 = vld [vmem:[#allocation11 + $0x2e4] ss:$28 sps:$4 sm:$0xff]  }
 0x244   :  { %v1819_v49 = vpop.f32.mrb[4].mxu1 }
 0x245   :  { %v4798_v50 = vadd.f32 %v1819_v49, %v369_v47  ;;  %v1821_v51 = vpop.f32.mrb[5].mxu1  ;;  %v5250_v47 = vld [vmem:[#allocation11 + $0xa8] ss:$28 sps:$4 sm:$0xff]  }
 0x246   :  { %v4799_v52 = vadd.f32 %v1821_v51, %v373_v48  ;;  %v1823_v53 = vpop.f32.mrb[6].mxu1  ;;  %v5253_v48 = vld [vmem:[#allocation11 + $0xb0] ss:$28 sps:$4 sm:$0xff]   ;;  %v5258_v49 = vld [vmem:[#allocation11 + $0xe4] ss:$28 sps:$4 sm:$0xff]  }
 0x247   :  { %v1828_v54 = vmax.f32 %v4798_v50, 0.0  ;;  %v1824_v55 = vpop.f32.mrb[7].mxu1  ;;  %v5261_v50 = vld [vmem:[#allocation11 + $0xec] ss:$28 sps:$4 sm:$0xff]   ;;  %v5256_v51 = vld [vmem:[#allocation11 + $0xe0] ss:$28 sps:$4 sm:$0xff]  }
 0x248   :  { %v1829_v56 = vmax.f32 %v4799_v52, 0.0  ;;  %v5259_v52 = vld [vmem:[#allocation11 + $0xe8] ss:$28 sps:$4 sm:$0xff]   ;;  %v5264_v53 = vld [vmem:[#allocation11 + $0x11c] ss:$28 sps:$4 sm:$0xff]  }
 0x249   :  { %v1832_v58 = vpack.c.bf16 %v1828_v54, %v1828_v54  ;;  %v5267_v54 = vld [vmem:[#allocation11 + $0x124] ss:$28 sps:$4 sm:$0xff]   ;;  %v5262_v55 = vld [vmem:[#allocation11 + $0x118] ss:$28 sps:$4 sm:$0xff]  }
 0x24a   :  { %v1833_v57 = vpack.c.bf16 %v1829_v56, %v1829_v56  ;;  %v5265_v56 = vld [vmem:[#allocation11 + $0x120] ss:$28 sps:$4 sm:$0xff]  }
 0x24c   :  { %2169 = vmatprep.mubr.bf16.mxu1 %v1833_v57  ;;  %v5270_v57 = vld [vmem:[#allocation11 + $0x154] ss:$28 sps:$4 sm:$0xff]  }
 0x24d   :  { %2170 = vmatmul.mubr.bf16.vlgmr.msra.gmra.mrb[8].mxu1 %v1832_v58  ;;  %v5273_v58 = vld [vmem:[#allocation11 + $0x15c] ss:$28 sps:$4 sm:$0xff]  }
 0x24e   :  { %2336 = vmatprep.mubr.bf16.mxu1 %v5782_v0  ;;  %2305 = vmatpush1.bf16.msra.mxu1 %v5225_v61  ;;  %v5276_v61 = vld [vmem:[#allocation11 + $0x18c] ss:$28 sps:$4 sm:$0xff]  }
 0x24f   :  { %4473 = vmatprep.subr.msk.bf16.mxu1 %vm2250_vm0, %v4470_v17  ;;  %v5309_v17 = vld [vmem:[#allocation11 + $0x2ac] ss:$28 sps:$4 sm:$0xff]  }
 0x252   :  { %2307 = vmatpush1.bf16.msra.mxu1 %v2258_v20  ;;  %v5312_v20 = vld [vmem:[#allocation11 + $0x2dc] ss:$28 sps:$4 sm:$0xff]  }
 0x253   :  { %3880 = vmatprep.subr.bf16.mxu1 %v5237_v22  ;;  %v5310_v22 = vld [vmem:[#allocation11 + $0x2d8] ss:$28 sps:$4 sm:$0xff]  }
 0x2e1   :  { %v4722_v63 = vpop.f32.mrb[4].mxu0 }
 0x2e2   :  { %v4723_v1 = vpop.f32.mrb[5].mxu0 }
 0x2e3   :  { %v4724_v2 = vadd.f32 %v4723_v1, %v4722_v63  ;;  %v4725_v3 = vpop.f32.mrb[6].mxu0  ;;  %v5274_v63 = vld [vmem:[#allocation11 + $0x188] ss:$28 sps:$4 sm:$0xff]   ;;  %v5277_v1 = vld [vmem:[#allocation11 + $0x190] ss:$28 sps:$4 sm:$0xff]  }
 0x2e4   :  { %v4726_v4 = vpop.f32.mrb[7].mxu0  ;;  %v5285_v3 = vld [vmem:[#allocation11 + $0x1cc] ss:$28 sps:$4 sm:$0xff]  }
 0x2e5   :  { %v2132_v0 = vadd.f32 %v4724_v2, %v4430_v5  ;;  %v5282_v2 = vld [vmem:[#allocation11 + $0x1c4] ss:$28 sps:$4 sm:$0xff]  }
 0x2e6   :  { %v5280_v4 = vld [vmem:[#allocation11 + $0x1c0] ss:$28 sps:$4 sm:$0xff]   ;;  %v5283_v5 = vld [vmem:[#allocation11 + $0x1c8] ss:$28 sps:$4 sm:$0xff]  }
 0x320   :  { %v4744_v6 = vpop.f32.mrb[8].mxu1 }
 0x321   :  { %v4745_v7 = vpop.f32.mrb[9].mxu1 }
 0x322   :  { %v4746_v8 = vadd.f32 %v4745_v7, %v4744_v6  ;;  %v4747_v9 = vpop.f32.mrb[10].mxu1  ;;  %v5288_v6 = vld [vmem:[#allocation11 + $0x1fc] ss:$28 sps:$4 sm:$0xff]   ;;  %v5291_v7 = vld [vmem:[#allocation11 + $0x204] ss:$28 sps:$4 sm:$0xff]  }
 0x323   :  { %v4748_v10 = vpop.f32.mrb[11].mxu1  ;;  %v5294_v9 = vld [vmem:[#allocation11 + $0x234] ss:$28 sps:$4 sm:$0xff]  }
 0x324   :  { %v2172_v11 = vadd.f32 %v4746_v8, %v2132_v0  ;;  %v5286_v0 = vld [vmem:[#allocation11 + $0x1f8] ss:$28 sps:$4 sm:$0xff]   ;;  %v5289_v8 = vld [vmem:[#allocation11 + $0x200] ss:$28 sps:$4 sm:$0xff]  }
 0x325   :  { %v5297_v10 = vld [vmem:[#allocation11 + $0x23c] ss:$28 sps:$4 sm:$0xff]  }
 0x326   :  { %v2178_v12 = vmul.f32 0.5, %v2172_v11  ;;  %4173 = vst [vmem:[#allocation14] sm:$0xff] %v2172_v11 }
 0x328   :  { %v2179_v36 = vmul.f32 1.442695, %v2178_v12  ;;  %v5295_v12 = vld [vmem:[#allocation11 + $0x238] ss:$28 sps:$4 sm:$0xff]  }
 0x32a   :  { %5552 = vpow2.f32 %v2179_v36  ;;  %v5298_v36 = vld [vmem:[#allocation11 + $0x268] ss:$28 sps:$4 sm:$0xff]  }
 0x334   :  { %v5553_v23 = vpop.eup %5552 }
 0x335   :  { %2182 = vrot.lane.b32.xlu0 %v5553_v23, %s5783_s5  ;;  %v5313_v23 = vld [vmem:[#allocation11 + $0x2e0] ss:$28 sps:$4 sm:$0xff]  }
 0x3a7   :  { %v2183_v25 = vpop.permute.xlu0 %2182 }
 0x3a8   :  { %v2185_v28 = vmul.f32 %v2183_v25, %v2177_v24  ;;  %v5318_v24 = vld [vmem:[#allocation11 + $0x314] ss:$28 sps:$4 sm:$0xff]   ;;  %v5321_v25 = vld [vmem:[#allocation11 + $0x31c] ss:$28 sps:$4 sm:$0xff]  }
 0x3aa   :  { %v2186_v30 = vadd.f32 %v2185_v28, %v2172_v11  ;;  %v5292_v11 = vld [vmem:[#allocation11 + $0x230] ss:$28 sps:$4 sm:$0xff]  }
 0x3ab   :  { %v5316_v28 = vld [vmem:[#allocation11 + $0x310] ss:$28 sps:$4 sm:$0xff]  }
 0x3ac   :  { %v2187_v33 = vpack.c.bf16 %v2186_v30, %v2186_v30  ;;  %v5319_v30 = vld [vmem:[#allocation11 + $0x318] ss:$28 sps:$4 sm:$0xff]  }
 0x3ae   :  { %4472 = vmatmul.mubr.msk.bf16.vlgmr.msra.gmra.mrb[8].mxu0 %vm2246_vm1, %v2187_v33  ;;  %4474 = vmatmul.mubr.msk.bf16.vlgmr.msra.gmra.mrb[12].mxu1 %vm2246_vm1, %v2187_v33  ;;  %v5322_v33 = vld [vmem:[#allocation11 + $0x348] ss:$28 sps:$4 sm:$0xff]  }
 0x3af   :  { %3799 = vmatpush1.bf16.msra.mxu0 %v5232_v31  ;;  %3881 = vmatpush1.bf16.msra.mxu1 %v5235_v32  ;;  %v5324_v31 = vld [vmem:[#allocation11 + $0x34c] ss:$28 sps:$4 sm:$0xff]   ;;  %v5327_v32 = vld [vmem:[#allocation11 + $0x354] ss:$28 sps:$4 sm:$0xff]  }
 0x3b0   :  { %3800 = vmatprep.subr.bf16.mxu0 %v5240_v34  ;;  %3882 = vmatprep.subr.bf16.mxu1 %v5243_v35  ;;  %v5325_v34 = vld [vmem:[#allocation11 + $0x350] ss:$28 sps:$4 sm:$0xff]   ;;  %v5330_v35 = vld [vmem:[#allocation11 + $0x384] ss:$28 sps:$4 sm:$0xff]  }
 0x3b3   :  { %3801 = vmatpush1.bf16.msra.mxu0 %v5238_v37  ;;  %3883 = vmatpush1.bf16.msra.mxu1 %v5241_v38  ;;  %v5333_v37 = vld [vmem:[#allocation11 + $0x38c] ss:$28 sps:$4 sm:$0xff]   ;;  %v5992_v38 = vld [vmem:[%s6079_s7] sm:$0xf] }
 0x3b4   :  { %3802 = vmatprep.subr.bf16.mxu0 %v5246_v39  ;;  %3884 = vmatprep.subr.bf16.mxu1 %v5249_v40  ;;  %v2199_v39 = vrot.slane %v5992_v38, %v5964_v27  ;;  %v2203_v40 = vrot.slane %v5992_v38, %v5970_v29 }
 0x3b7   :  { %3803 = vmatpush1.bf16.msra.mxu0 %v5244_v41  ;;  %3885 = vmatpush1.bf16.msra.mxu1 %v5247_v42  ;;  %v2211_v41 = vrot.slane %v5992_v38, %v5981_v46 }
 0x3b8   :  { %3804 = vmatprep.subr.bf16.mxu0 %v5252_v43  ;;  %3886 = vmatprep.subr.bf16.mxu1 %v5255_v44 }
 0x3bb   :  { %3805 = vmatpush1.bf16.msra.mxu0 %v5250_v47  ;;  %3887 = vmatpush1.bf16.msra.mxu1 %v5253_v48 }
 0x3bc   :  { %3806 = vmatprep.subr.bf16.mxu0 %v5258_v49  ;;  %3888 = vmatprep.subr.bf16.mxu1 %v5261_v50 }
 0x3bf   :  { %3807 = vmatpush1.bf16.msra.mxu0 %v5256_v51  ;;  %3889 = vmatpush1.bf16.msra.mxu1 %v5259_v52 }
 0x3c0   :  { %3808 = vmatprep.subr.bf16.mxu0 %v5264_v53  ;;  %3890 = vmatprep.subr.bf16.mxu1 %v5267_v54 }
 0x3c3   :  { %3809 = vmatpush1.bf16.msra.mxu0 %v5262_v55  ;;  %3891 = vmatpush1.bf16.msra.mxu1 %v5265_v56 }
 0x3c4   :  { %3810 = vmatprep.subr.bf16.mxu0 %v5270_v57  ;;  %3892 = vmatprep.subr.bf16.mxu1 %v5273_v58 }
 0x3c7   :  { %3811 = vmatpush1.bf16.msra.mxu0 %v5268_v59  ;;  %3893 = vmatpush1.bf16.msra.mxu1 %v5271_v60  ;;  %v5328_v59 = vld [vmem:[#allocation11 + $0x380] ss:$28 sps:$4 sm:$0xff]   ;;  %v5331_v60 = vld [vmem:[#allocation11 + $0x388] ss:$28 sps:$4 sm:$0xff]  }
 0x3c8   :  { %3812 = vmatprep.subr.bf16.mxu0 %v5276_v61  ;;  %3894 = vmatprep.subr.bf16.mxu1 %v5279_v62  ;;  %v5336_v62 = vld [vmem:[#allocation11 + $0x3bc] ss:$28 sps:$4 sm:$0xff]  }
 0x3cb   :  { %3813 = vmatpush1.bf16.msra.mxu0 %v5274_v63  ;;  %3895 = vmatpush1.bf16.msra.mxu1 %v5277_v1  ;;  %v5339_v63 = vld [vmem:[#allocation11 + $0x3c4] ss:$28 sps:$4 sm:$0xff]  }
 0x3cc   :  { %3814 = vmatprep.subr.bf16.mxu0 %v5282_v2  ;;  %3896 = vmatprep.subr.bf16.mxu1 %v5285_v3  ;;  %v5334_v2 = vld [vmem:[#allocation11 + $0x3b8] ss:$28 sps:$4 sm:$0xff]   ;;  %v5337_v3 = vld [vmem:[#allocation11 + $0x3c0] ss:$28 sps:$4 sm:$0xff]  }
 0x3cf   :  { %3815 = vmatpush1.bf16.msra.mxu0 %v5280_v4  ;;  %3897 = vmatpush1.bf16.msra.mxu1 %v5283_v5  ;;  %v5342_v4 = vld [vmem:[#allocation11 + $0x3f4] ss:$28 sps:$4 sm:$0xff]   ;;  %v5345_v5 = vld [vmem:[#allocation11 + $0x3fc] ss:$28 sps:$4 sm:$0xff]  }
 0x3d0   :  { %3816 = vmatprep.subr.bf16.mxu0 %v5288_v6  ;;  %3898 = vmatprep.subr.bf16.mxu1 %v5291_v7  ;;  %v5340_v6 = vld [vmem:[#allocation11 + $0x3f0] ss:$28 sps:$4 sm:$0xff]   ;;  %v5343_v7 = vld [vmem:[#allocation11 + $0x3f8] ss:$28 sps:$4 sm:$0xff]  }
 0x3d3   :  { %3817 = vmatpush1.bf16.msra.mxu0 %v5286_v0  ;;  %3899 = vmatpush1.bf16.msra.mxu1 %v5289_v8  ;;  %v5348_v0 = vld [vmem:[#allocation11 + $0x42c] ss:$28 sps:$4 sm:$0xff]   ;;  %v5351_v8 = vld [vmem:[#allocation11 + $0x434] ss:$28 sps:$4 sm:$0xff]  }
 0x3d4   :  { %3818 = vmatprep.subr.bf16.mxu0 %v5294_v9  ;;  %3900 = vmatprep.subr.bf16.mxu1 %v5297_v10  ;;  %v5346_v9 = vld [vmem:[#allocation11 + $0x428] ss:$28 sps:$4 sm:$0xff]   ;;  %v5349_v10 = vld [vmem:[#allocation11 + $0x430] ss:$28 sps:$4 sm:$0xff]  }
 0x3d7   :  { %3819 = vmatpush1.bf16.msra.mxu0 %v5292_v11  ;;  %3901 = vmatpush1.bf16.msra.mxu1 %v5295_v12  ;;  %v5354_v11 = vld [vmem:[#allocation11 + $0x464] ss:$28 sps:$4 sm:$0xff]   ;;  %v5357_v12 = vld [vmem:[#allocation11 + $0x46c] ss:$28 sps:$4 sm:$0xff]  }
 0x3d8   :  { %3820 = vmatprep.subr.bf16.mxu0 %v5300_v13  ;;  %3902 = vmatprep.subr.bf16.mxu1 %v5303_v14  ;;  %v5352_v13 = vld [vmem:[#allocation11 + $0x460] ss:$28 sps:$4 sm:$0xff]   ;;  %v5355_v14 = vld [vmem:[#allocation11 + $0x468] ss:$28 sps:$4 sm:$0xff]  }
 0x3db   :  { %3821 = vmatpush1.bf16.msra.mxu0 %v5298_v36  ;;  %3903 = vmatpush1.bf16.msra.mxu1 %v5301_v15  ;;  %v5360_v36 = vld [vmem:[#allocation11 + $0x49c] ss:$28 sps:$4 sm:$0xff]   ;;  %v5363_v15 = vld [vmem:[#allocation11 + $0x4a4] ss:$28 sps:$4 sm:$0xff]  }
 0x3dc   :  { %3822 = vmatprep.subr.bf16.mxu0 %v5306_v16  ;;  %3904 = vmatprep.subr.bf16.mxu1 %v5309_v17  ;;  %v5358_v16 = vld [vmem:[#allocation11 + $0x498] ss:$28 sps:$4 sm:$0xff]   ;;  %v5361_v17 = vld [vmem:[#allocation11 + $0x4a0] ss:$28 sps:$4 sm:$0xff]  }
 0x3df   :  { %3823 = vmatpush1.bf16.msra.mxu0 %v5304_v18  ;;  %3905 = vmatpush1.bf16.msra.mxu1 %v5307_v19  ;;  %v5366_v18 = vld [vmem:[#allocation11 + $0x4d4] ss:$28 sps:$4 sm:$0xff]   ;;  %v5369_v19 = vld [vmem:[#allocation11 + $0x4dc] ss:$28 sps:$4 sm:$0xff]  }
 0x3e0   :  { %3824 = vmatprep.subr.bf16.mxu0 %v5312_v20  ;;  %3906 = vmatprep.subr.bf16.mxu1 %v5315_v21  ;;  %v5364_v20 = vld [vmem:[#allocation11 + $0x4d0] ss:$28 sps:$4 sm:$0xff]   ;;  %v5367_v21 = vld [vmem:[#allocation11 + $0x4d8] ss:$28 sps:$4 sm:$0xff]  }
 0x3e3   :  { %3825 = vmatpush1.bf16.msra.mxu0 %v5310_v22  ;;  %3907 = vmatpush1.bf16.msra.mxu1 %v5313_v23  ;;  %v5372_v22 = vld [vmem:[#allocation11 + $0x50c] ss:$28 sps:$4 sm:$0xff]   ;;  %v5375_v23 = vld [vmem:[#allocation11 + $0x514] ss:$28 sps:$4 sm:$0xff]  }
 0x3e4   :  { %3826 = vmatprep.subr.bf16.mxu0 %v5318_v24  ;;  %3908 = vmatprep.subr.bf16.mxu1 %v5321_v25  ;;  %v5370_v24 = vld [vmem:[#allocation11 + $0x508] ss:$28 sps:$4 sm:$0xff]   ;;  %v5373_v25 = vld [vmem:[#allocation11 + $0x510] ss:$28 sps:$4 sm:$0xff]  }
 0x3e7   :  { %3827 = vmatpush1.bf16.msra.mxu0 %v5316_v28  ;;  %3909 = vmatpush1.bf16.msra.mxu1 %v5319_v30  ;;  %v5378_v28 = vld [vmem:[#allocation11 + $0x544] ss:$28 sps:$4 sm:$0xff]   ;;  %v5381_v30 = vld [vmem:[#allocation11 + $0x54c] ss:$28 sps:$4 sm:$0xff]  }
 0x3e8   :  { %3828 = vmatprep.subr.bf16.mxu0 %v5324_v31  ;;  %3910 = vmatprep.subr.bf16.mxu1 %v5327_v32  ;;  %v5376_v31 = vld [vmem:[#allocation11 + $0x540] ss:$28 sps:$4 sm:$0xff]   ;;  %v5379_v32 = vld [vmem:[#allocation11 + $0x548] ss:$28 sps:$4 sm:$0xff]  }
 0x3eb   :  { %3829 = vmatpush1.bf16.msra.mxu0 %v5322_v33  ;;  %3911 = vmatpush1.bf16.msra.mxu1 %v5325_v34  ;;  %v5384_v33 = vld [vmem:[#allocation11 + $0x57c] ss:$28 sps:$4 sm:$0xff]   ;;  %v5387_v34 = vld [vmem:[#allocation11 + $0x584] ss:$28 sps:$4 sm:$0xff]  }
 0x3ec   :  { %3839 = vmatprep.subr.bf16.mxu0 %v5330_v35  ;;  %3921 = vmatprep.subr.bf16.mxu1 %v5333_v37  ;;  %v5382_v35 = vld [vmem:[#allocation11 + $0x578] ss:$28 sps:$4 sm:$0xff]   ;;  %v5385_v37 = vld [vmem:[#allocation11 + $0x580] ss:$28 sps:$4 sm:$0xff]  }
 0x481   :  { %v2297_v42 = vpop.f32.mrb[8].mxu0  ;;  %v6000_v43 = vpop.f32.mrb[12].mxu1 }
 0x482   :  { %v2298_v44 = vadd.f32 %v2297_v42, %v2199_v39  ;;  %v2299_v47 = vpop.f32.mrb[9].mxu0  ;;  %v2340_v48 = vpop.f32.mrb[13].mxu1  ;;  %v5390_v39 = vld [vmem:[#allocation11 + $0x5b4] ss:$28 sps:$4 sm:$0xff]  }
 0x483   :  { %v2300_v49 = vadd.f32 %v2299_v47, %v2203_v40  ;;  %v2341_v50 = vadd.f32 %v2340_v48, %v2211_v41  ;;  %v2301_v51 = vpop.f32.mrb[10].mxu0  ;;  %v2342_v52 = vpop.f32.mrb[14].mxu1  ;;  %v5393_v40 = vld [vmem:[#allocation11 + $0x5bc] ss:$28 sps:$4 sm:$0xff]   ;;  %v5388_v41 = vld [vmem:[#allocation11 + $0x5b0] ss:$28 sps:$4 sm:$0xff]  }
 0x484   :  { %v2345_v53 = vmax.f32 %v2298_v44, 0.0  ;;  %v2302_v54 = vpop.f32.mrb[11].mxu0  ;;  %v2343_v55 = vpop.f32.mrb[15].mxu1  ;;  %v5391_v42 = vld [vmem:[#allocation11 + $0x5b8] ss:$28 sps:$4 sm:$0xff]  }
 0x485   :  { %v2346_v56 = vmax.f32 %v2300_v49, 0.0  ;;  %v2348_v57 = vmax.f32 %v2341_v50, 0.0  ;;  %v5396_v44 = vld [vmem:[#allocation11 + $0x5ec] ss:$28 sps:$4 sm:$0xff]   ;;  %v5399_v47 = vld [vmem:[#allocation11 + $0x5f4] ss:$28 sps:$4 sm:$0xff]  }
 0x486   :  { %v6004_v61 = vpack.c.bf16 %v2345_v53, %v2345_v53  ;;  %v5394_v48 = vld [vmem:[#allocation11 + $0x5e8] ss:$28 sps:$4 sm:$0xff]   ;;  %v5397_v49 = vld [vmem:[#allocation11 + $0x5f0] ss:$28 sps:$4 sm:$0xff]   ;;  %v5400_v52 = vld [vmem:[#allocation11 + $0x620] ss:$28 sps:$4 sm:$0xff]  }
 0x487   :  { %v6002_v58 = vpack.c.bf16 %v2346_v56, %v2346_v56  ;;  %v6008_v1 = vpack.c.bf16 %v2348_v57, %v2348_v57  ;;  %v5402_v50 = vld [vmem:[#allocation11 + $0x624] ss:$28 sps:$4 sm:$0xff]   ;;  %v5405_v51 = vld [vmem:[#allocation11 + $0x62c] ss:$28 sps:$4 sm:$0xff]   ;;  %v5408_v54 = vld [vmem:[#allocation11 + $0x65c] ss:$28 sps:$4 sm:$0xff]  }
 0x488   :  { %v5403_v53 = vld [vmem:[#allocation11 + $0x628] ss:$28 sps:$4 sm:$0xff]   ;;  %v5406_v56 = vld [vmem:[#allocation11 + $0x658] ss:$28 sps:$4 sm:$0xff]   ;;  %v5409_v57 = vld [vmem:[#allocation11 + $0x660] ss:$28 sps:$4 sm:$0xff]  }
 0x489   :  { %3830 = vmatprep.mubr.bf16.mxu0 %v6002_v58  ;;  %3912 = vmatprep.mubr.bf16.mxu1 %v6002_v58  ;;  %v5411_v55 = vld [vmem:[#allocation11 + $0x664] ss:$28 sps:$4 sm:$0xff]  }
 0x48a   :  { %3831 = vmatmul.mubr.bf16.vlgmr.msra.gmra.mrb[12].mxu0 %v6004_v61  ;;  %3913 = vmatmul.mubr.bf16.vlgmr.msra.gmra.mrb[16].mxu1 %v6004_v61 }
 0x48b   :  { %3840 = vmatpush1.bf16.msra.mxu0 %v5328_v59  ;;  %3922 = vmatpush1.bf16.msra.mxu1 %v5331_v60  ;;  %v2207_v59 = vrot.slane %v5992_v38, %v5978_v45  ;;  %v5414_v60 = vld [vmem:[#allocation11 + $0x694] ss:$28 sps:$4 sm:$0xff]  }
 0x48c   :  { %3871 = vmatprep.mubr.bf16.mxu0 %v6008_v1  ;;  %3953 = vmatprep.mubr.bf16.mxu1 %v6008_v1  ;;  %v5426_v38 = vld [vmem:[#allocation11 + $0x14] ss:$28 sps:$4 sm:$0xff]  }
 0x48d   :  { %3841 = vmatprep.subr.bf16.mxu0 %v5336_v62  ;;  %3923 = vmatprep.subr.bf16.mxu1 %v5339_v63  ;;  %v5417_v62 = vld [vmem:[#allocation11 + $0x69c] ss:$28 sps:$4 sm:$0xff]   ;;  %v5412_v63 = vld [vmem:[#allocation11 + $0x690] ss:$28 sps:$4 sm:$0xff]  }
 0x48f   :  { %3842 = vmatpush1.bf16.msra.mxu0 %v5334_v2  ;;  %3924 = vmatpush1.bf16.msra.mxu1 %v5337_v3  ;;  %v5415_v2 = vld [vmem:[#allocation11 + $0x698] ss:$28 sps:$4 sm:$0xff]   ;;  %v2339_v3 = vadd.f32 %v6000_v43, %v2207_v59  ;;  %v5482_v59 = vld [vmem:[#allocation11 + $0x600] ss:$28 sps:$4 sm:$0xff]  }
 0x490   :  { %3843 = vmatprep.subr.bf16.mxu0 %v5342_v4  ;;  %3925 = vmatprep.subr.bf16.mxu1 %v5345_v5  ;;  %v5420_v4 = vld [vmem:[#allocation11 + $0x6cc] ss:$28 sps:$4 sm:$0xff]   ;;  %v5423_v5 = vld [vmem:[#allocation11 + $0x6d4] ss:$28 sps:$4 sm:$0xff]  }
 0x491   :  { %v5428_v43 = vld [vmem:[#allocation11 + $0x18] ss:$28 sps:$4 sm:$0xff]  }
 0x493   :  { %3844 = vmatpush1.bf16.msra.mxu0 %v5340_v6  ;;  %3926 = vmatpush1.bf16.msra.mxu1 %v5343_v7  ;;  %v5418_v6 = vld [vmem:[#allocation11 + $0x6c8] ss:$28 sps:$4 sm:$0xff]   ;;  %v5421_v7 = vld [vmem:[#allocation11 + $0x6d0] ss:$28 sps:$4 sm:$0xff]  }
 0x494   :  { %3845 = vmatprep.subr.bf16.mxu0 %v5348_v0  ;;  %3927 = vmatprep.subr.bf16.mxu1 %v5351_v8  ;;  %v2347_v0 = vmax.f32 %v2339_v3, 0.0  ;;  %v5427_v8 = vld [vmem:[#allocation11 + $0x1d8] ss:$28 sps:$4 sm:$0xff]   ;;  %v5484_v3 = vld [vmem:[#allocation11 + $0x2b0] ss:$28 sps:$4 sm:$0xff]  }
 0x497   :  { %3846 = vmatpush1.bf16.msra.mxu0 %v5346_v9  ;;  %3928 = vmatpush1.bf16.msra.mxu1 %v5349_v10  ;;  %v5424_v9 = vld [vmem:[#allocation11 + $0x10] ss:$28 sps:$4 sm:$0xff]   ;;  %v6017_v10 = vpack.c.bf16 %v2347_v0, %v2347_v0 }
 0x498   :  { %3847 = vmatprep.subr.bf16.mxu0 %v5354_v11  ;;  %3929 = vmatprep.subr.bf16.mxu1 %v5357_v12  ;;  %v5431_v11 = vld [vmem:[#allocation11 + $0x4c] ss:$28 sps:$4 sm:$0xff]  }
 0x499   :  { %v5432_v12 = vld [vmem:[#allocation11 + $0x210] ss:$28 sps:$4 sm:$0xff]  }
 0x49a   :  { %v5493_v0 = vld [vmem:[#allocation11 + $0x4b0] ss:$28 sps:$4 sm:$0xff]  }
 0x49b   :  { %3848 = vmatpush1.bf16.msra.mxu0 %v5352_v13  ;;  %3930 = vmatpush1.bf16.msra.mxu1 %v5355_v14  ;;  %v5429_v13 = vld [vmem:[#allocation11 + $0x48] ss:$28 sps:$4 sm:$0xff]   ;;  %v5433_v14 = vld [vmem:[#allocation11 + $0x50] ss:$28 sps:$4 sm:$0xff]  }
 0x49c   :  { %3849 = vmatprep.subr.bf16.mxu0 %v5360_v36  ;;  %3931 = vmatprep.subr.bf16.mxu1 %v5363_v15  ;;  %v5436_v36 = vld [vmem:[#allocation11 + $0x84] ss:$28 sps:$4 sm:$0xff]  }
 0x49d   :  { %v5437_v15 = vld [vmem:[#allocation11 + $0x248] ss:$28 sps:$4 sm:$0xff]  }
 0x49f   :  { %3850 = vmatpush1.bf16.msra.mxu0 %v5358_v16  ;;  %3932 = vmatpush1.bf16.msra.mxu1 %v5361_v17  ;;  %v5434_v16 = vld [vmem:[#allocation11 + $0x80] ss:$28 sps:$4 sm:$0xff]   ;;  %v5438_v17 = vld [vmem:[#allocation11 + $0x88] ss:$28 sps:$4 sm:$0xff]  }
 0x4a0   :  { %3851 = vmatprep.subr.bf16.mxu0 %v5366_v18  ;;  %3933 = vmatprep.subr.bf16.mxu1 %v5369_v19  ;;  %v5441_v18 = vld [vmem:[#allocation11 + $0xbc] ss:$28 sps:$4 sm:$0xff]  }
 0x4a1   :  { %v5442_v19 = vld [vmem:[#allocation11 + $0x280] ss:$28 sps:$4 sm:$0xff]  }
 0x4a3   :  { %3852 = vmatpush1.bf16.msra.mxu0 %v5364_v20  ;;  %3934 = vmatpush1.bf16.msra.mxu1 %v5367_v21  ;;  %v5439_v20 = vld [vmem:[#allocation11 + $0xb8] ss:$28 sps:$4 sm:$0xff]   ;;  %v5443_v21 = vld [vmem:[#allocation11 + $0xc0] ss:$28 sps:$4 sm:$0xff]  }
 0x4a4   :  { %3853 = vmatprep.subr.bf16.mxu0 %v5372_v22  ;;  %3935 = vmatprep.subr.bf16.mxu1 %v5375_v23  ;;  %v5446_v22 = vld [vmem:[#allocation11 + $0xf4] ss:$28 sps:$4 sm:$0xff]  }
 0x4a5   :  { %v5444_v23 = vld [vmem:[#allocation11 + $0xf0] ss:$28 sps:$4 sm:$0xff]  }
 0x4a7   :  { %3854 = vmatpush1.bf16.msra.mxu0 %v5370_v24  ;;  %3936 = vmatpush1.bf16.msra.mxu1 %v5373_v25  ;;  %v5448_v24 = vld [vmem:[#allocation11 + $0xf8] ss:$28 sps:$4 sm:$0xff]   ;;  %v5451_v25 = vld [vmem:[#allocation11 + $0x12c] ss:$28 sps:$4 sm:$0xff]  }
 0x4a8   :  { %3855 = vmatprep.subr.bf16.mxu0 %v5378_v28  ;;  %3937 = vmatprep.subr.bf16.mxu1 %v5381_v30  ;;  %v5452_v28 = vld [vmem:[#allocation11 + $0x2f0] ss:$28 sps:$4 sm:$0xff]   ;;  %v5449_v30 = vld [vmem:[#allocation11 + $0x128] ss:$28 sps:$4 sm:$0xff]  }
 0x4ab   :  { %3856 = vmatpush1.bf16.msra.mxu0 %v5376_v31  ;;  %3938 = vmatpush1.bf16.msra.mxu1 %v5379_v32  ;;  %v5453_v31 = vld [vmem:[#allocation11 + $0x130] ss:$28 sps:$4 sm:$0xff]   ;;  %v5456_v32 = vld [vmem:[#allocation11 + $0x164] ss:$28 sps:$4 sm:$0xff]  }
 0x4ac   :  { %3857 = vmatprep.subr.bf16.mxu0 %v5384_v33  ;;  %3939 = vmatprep.subr.bf16.mxu1 %v5387_v34  ;;  %v5457_v33 = vld [vmem:[#allocation11 + $0x328] ss:$28 sps:$4 sm:$0xff]   ;;  %v5454_v34 = vld [vmem:[#allocation11 + $0x160] ss:$28 sps:$4 sm:$0xff]  }
 0x4af   :  { %3858 = vmatpush1.bf16.msra.mxu0 %v5382_v35  ;;  %3940 = vmatpush1.bf16.msra.mxu1 %v5385_v37  ;;  %v5458_v35 = vld [vmem:[#allocation11 + $0x168] ss:$28 sps:$4 sm:$0xff]   ;;  %v5461_v37 = vld [vmem:[#allocation11 + $0x19c] ss:$28 sps:$4 sm:$0xff]  }
 0x4b0   :  { %3859 = vmatprep.subr.bf16.mxu0 %v5390_v39  ;;  %3941 = vmatprep.subr.bf16.mxu1 %v5393_v40  ;;  %v5462_v39 = vld [vmem:[#allocation11 + $0x360] ss:$28 sps:$4 sm:$0xff]   ;;  %v5459_v40 = vld [vmem:[#allocation11 + $0x198] ss:$28 sps:$4 sm:$0xff]  }
 0x4b3   :  { %3860 = vmatpush1.bf16.msra.mxu0 %v5388_v41  ;;  %3942 = vmatpush1.bf16.msra.mxu1 %v5391_v42  ;;  %v5463_v41 = vld [vmem:[#allocation11 + $0x1a0] ss:$28 sps:$4 sm:$0xff]   ;;  %v5466_v42 = vld [vmem:[#allocation11 + $0x1d4] ss:$28 sps:$4 sm:$0xff]  }
 0x4b4   :  { %3861 = vmatprep.subr.bf16.mxu0 %v5396_v44  ;;  %3943 = vmatprep.subr.bf16.mxu1 %v5399_v47  ;;  %v5467_v44 = vld [vmem:[#allocation11 + $0x558] ss:$28 sps:$4 sm:$0xff]   ;;  %v5464_v47 = vld [vmem:[#allocation11 + $0x1d0] ss:$28 sps:$4 sm:$0xff]  }
 0x4b7   :  { %3862 = vmatpush1.bf16.msra.mxu0 %v5394_v48  ;;  %3944 = vmatpush1.bf16.msra.mxu1 %v5397_v49  ;;  %v5468_v48 = vld [vmem:[#allocation11 + $0x398] ss:$28 sps:$4 sm:$0xff]   ;;  %v5471_v49 = vld [vmem:[#allocation11 + $0x20c] ss:$28 sps:$4 sm:$0xff]  }
 0x4b8   :  { %3863 = vmatprep.subr.bf16.mxu0 %v5402_v50  ;;  %3945 = vmatprep.subr.bf16.mxu1 %v5405_v51  ;;  %v5472_v50 = vld [vmem:[#allocation11 + $0x590] ss:$28 sps:$4 sm:$0xff]   ;;  %v5469_v51 = vld [vmem:[#allocation11 + $0x208] ss:$28 sps:$4 sm:$0xff]  }
 0x4bb   :  { %3864 = vmatpush1.bf16.msra.mxu0 %v5400_v52  ;;  %3946 = vmatpush1.bf16.msra.mxu1 %v5403_v53  ;;  %v5473_v52 = vld [vmem:[#allocation11 + $0x3d0] ss:$28 sps:$4 sm:$0xff]   ;;  %v5476_v53 = vld [vmem:[#allocation11 + $0x244] ss:$28 sps:$4 sm:$0xff]  }
 0x4bc   :  { %3865 = vmatprep.subr.bf16.mxu0 %v5408_v54  ;;  %3947 = vmatprep.subr.bf16.mxu1 %v5411_v55  ;;  %v5477_v54 = vld [vmem:[#allocation11 + $0x5c8] ss:$28 sps:$4 sm:$0xff]   ;;  %v5474_v55 = vld [vmem:[#allocation11 + $0x240] ss:$28 sps:$4 sm:$0xff]  }
 0x4bf   :  { %3866 = vmatpush1.bf16.msra.mxu0 %v5406_v56  ;;  %3948 = vmatpush1.bf16.msra.mxu1 %v5409_v57  ;;  %v5478_v56 = vld [vmem:[#allocation11 + $0x408] ss:$28 sps:$4 sm:$0xff]   ;;  %v5481_v57 = vld [vmem:[#allocation11 + $0x27c] ss:$28 sps:$4 sm:$0xff]  }
 0x4c0   :  { %3867 = vmatprep.subr.bf16.mxu0 %v5414_v60  ;;  %3949 = vmatprep.subr.bf16.mxu1 %v5417_v62  ;;  %v5479_v60 = vld [vmem:[#allocation11 + $0x278] ss:$28 sps:$4 sm:$0xff]   ;;  %v5483_v62 = vld [vmem:[#allocation11 + $0x440] ss:$28 sps:$4 sm:$0xff]  }
 0x4c3   :  { %3868 = vmatpush1.bf16.msra.mxu0 %v5412_v63  ;;  %3950 = vmatpush1.bf16.msra.mxu1 %v5415_v2  ;;  %v5486_v63 = vld [vmem:[#allocation11 + $0x2b4] ss:$28 sps:$4 sm:$0xff]  }
 0x4c4   :  { %3869 = vmatprep.subr.bf16.mxu0 %v5420_v4  ;;  %3951 = vmatprep.subr.bf16.mxu1 %v5423_v5  ;;  %v5487_v2 = vld [vmem:[#allocation11 + $0x638] ss:$28 sps:$4 sm:$0xff]   ;;  %v5491_v5 = vld [vmem:[#allocation11 + $0x2ec] ss:$28 sps:$4 sm:$0xff]  }
 0x4c5   :  { %v5488_v4 = vld [vmem:[#allocation11 + $0x478] ss:$28 sps:$4 sm:$0xff]  }
 0x4c7   :  { %3870 = vmatpush1.bf16.msra.mxu0 %v5418_v6  ;;  %3952 = vmatpush1.bf16.msra.mxu1 %v5421_v7  ;;  %v5492_v6 = vld [vmem:[#allocation11 + $0x670] ss:$28 sps:$4 sm:$0xff]   ;;  %v5489_v7 = vld [vmem:[#allocation11 + $0x2e8] ss:$28 sps:$4 sm:$0xff]  }
 0x4c8   :  { %3962 = vmatprep.subr.bf16.mxu0 %v5426_v38  ;;  %4750 = vmatprep.subr.bf16.mxu1 %v5427_v8  ;;  %v5496_v38 = vld [vmem:[#allocation11 + $0x324] ss:$28 sps:$4 sm:$0xff]  }
 0x4c9   :  { %v5497_v8 = vld [vmem:[#allocation11 + $0x6a8] ss:$28 sps:$4 sm:$0xff]  }
 0x4ca   :  { %3872 = vmatmul.mubr.bf16.vlgmr.msra.gmra.mrb[12].mxu0 %v6017_v10  ;;  %3954 = vmatmul.mubr.bf16.vlgmr.msra.gmra.mrb[16].mxu1 %v6017_v10 }
 0x4cb   :  { %3963 = vmatpush1.bf16.msra.mxu0 %v5424_v9  ;;  %3994 = vmatprep.mubr.bf16.mxu0 %v6002_v58  ;;  %v5494_v9 = vld [vmem:[#allocation11 + $0x320] ss:$28 sps:$4 sm:$0xff]  }
 0x4cc   :  { %4751 = vmatpush3.bf16.msra.mxu1 %v5428_v43  ;;  %4076 = vmatprep.mubr.bf16.mxu1 %v6002_v58  ;;  %v5447_v58 = vld [vmem:[#allocation11 + $0x2b8] ss:$28 sps:$4 sm:$0xff]   ;;  %v5498_v43 = vld [vmem:[#allocation11 + $0x4e8] ss:$28 sps:$4 sm:$0xff]  }
 0x4cd   :  { %3964 = vmatprep.subr.bf16.mxu0 %v5431_v11  ;;  %4752 = vmatprep.subr.bf16.mxu1 %v5432_v12  ;;  %v5501_v11 = vld [vmem:[#allocation11 + $0x35c] ss:$28 sps:$4 sm:$0xff]  }
 0x4ce   :  { %v5502_v12 = vld [vmem:[#allocation11 + $0x6e0] ss:$28 sps:$4 sm:$0xff]  }
 0x4cf   :  { %3965 = vmatpush1.bf16.msra.mxu0 %v5429_v13  ;;  %v5499_v13 = vld [vmem:[#allocation11 + $0x358] ss:$28 sps:$4 sm:$0xff]  }
 0x4d0   :  { %4753 = vmatpush3.bf16.msra.mxu1 %v5433_v14  ;;  %3966 = vmatprep.subr.bf16.mxu0 %v5436_v36  ;;  %v5503_v14 = vld [vmem:[#allocation11 + $0x520] ss:$28 sps:$4 sm:$0xff]   ;;  %v5506_v36 = vld [vmem:[#allocation11 + $0x394] ss:$28 sps:$4 sm:$0xff]  }
 0x4d1   :  { %4754 = vmatprep.subr.bf16.mxu1 %v5437_v15  ;;  %v5504_v15 = vld [vmem:[#allocation11 + $0x390] ss:$28 sps:$4 sm:$0xff]  }
 0x4d3   :  { %3967 = vmatpush1.bf16.msra.mxu0 %v5434_v16  ;;  %v5509_v16 = vld [vmem:[#allocation11 + $0x3cc] ss:$28 sps:$4 sm:$0xff]  }
 0x4d4   :  { %4755 = vmatpush3.bf16.msra.mxu1 %v5438_v17  ;;  %3968 = vmatprep.subr.bf16.mxu0 %v5441_v18  ;;  %v5507_v17 = vld [vmem:[#allocation11 + $0x3c8] ss:$28 sps:$4 sm:$0xff]  }
 0x4d5   :  { %4756 = vmatprep.subr.bf16.mxu1 %v5442_v19  ;;  %v5512_v18 = vld [vmem:[#allocation11 + $0x404] ss:$28 sps:$4 sm:$0xff]  }
 0x4d6   :  { %v5510_v19 = vld [vmem:[#allocation11 + $0x400] ss:$28 sps:$4 sm:$0xff]  }
 0x4d7   :  { %3969 = vmatpush1.bf16.msra.mxu0 %v5439_v20  ;;  %v5515_v20 = vld [vmem:[#allocation11 + $0x43c] ss:$28 sps:$4 sm:$0xff]  }
 0x4d8   :  { %4757 = vmatpush3.bf16.msra.mxu1 %v5443_v21  ;;  %3970 = vmatprep.subr.bf16.mxu0 %v5446_v22  ;;  %v5513_v21 = vld [vmem:[#allocation11 + $0x438] ss:$28 sps:$4 sm:$0xff]  }
 0x4d9   :  { %4758 = vmatprep.subr.bf16.mxu1 %v5447_v58  ;;  %v5518_v22 = vld [vmem:[#allocation11 + $0x474] ss:$28 sps:$4 sm:$0xff]  }
 0x4da   :  { %v5516_v58 = vld [vmem:[#allocation11 + $0x470] ss:$28 sps:$4 sm:$0xff]  }
 0x4db   :  { %3971 = vmatpush1.bf16.msra.mxu0 %v5444_v23  ;;  %v5519_v23 = vld [vmem:[#allocation11 + $0x4a8] ss:$28 sps:$4 sm:$0xff]  }
 0x4dc   :  { %4759 = vmatpush3.bf16.msra.mxu1 %v5448_v24  ;;  %3972 = vmatprep.subr.bf16.mxu0 %v5451_v25  ;;  %v5524_v24 = vld [vmem:[#allocation11 + $0x4e4] ss:$28 sps:$4 sm:$0xff]   ;;  %v5527_v25 = vld [vmem:[#allocation11 + $0x51c] ss:$28 sps:$4 sm:$0xff]  }
 0x4dd   :  { %4760 = vmatprep.subr.bf16.mxu1 %v5452_v28  ;;  %v5525_v28 = vld [vmem:[#allocation11 + $0x518] ss:$28 sps:$4 sm:$0xff]  }
 0x4df   :  { %3973 = vmatpush1.bf16.msra.mxu0 %v5449_v30  ;;  %v5530_v30 = vld [vmem:[#allocation11 + $0x554] ss:$28 sps:$4 sm:$0xff]  }
 0x4e0   :  { %4761 = vmatpush3.bf16.msra.mxu1 %v5453_v31  ;;  %3974 = vmatprep.subr.bf16.mxu0 %v5456_v32  ;;  %v5528_v31 = vld [vmem:[#allocation11 + $0x550] ss:$28 sps:$4 sm:$0xff]  }
 0x4e1   :  { %4762 = vmatprep.subr.bf16.mxu1 %v5457_v33  ;;  %v5533_v32 = vld [vmem:[#allocation11 + $0x58c] ss:$28 sps:$4 sm:$0xff]  }
 0x4e2   :  { %v5531_v33 = vld [vmem:[#allocation11 + $0x588] ss:$28 sps:$4 sm:$0xff]  }
 0x4e3   :  { %3975 = vmatpush1.bf16.msra.mxu0 %v5454_v34  ;;  %v5536_v34 = vld [vmem:[#allocation11 + $0x5c4] ss:$28 sps:$4 sm:$0xff]  }
 0x4e4   :  { %4763 = vmatpush3.bf16.msra.mxu1 %v5458_v35  ;;  %3976 = vmatprep.subr.bf16.mxu0 %v5461_v37  ;;  %v5534_v35 = vld [vmem:[#allocation11 + $0x5c0] ss:$28 sps:$4 sm:$0xff]  }
 0x4e5   :  { %4764 = vmatprep.subr.bf16.mxu1 %v5462_v39  ;;  %v5539_v37 = vld [vmem:[#allocation11 + $0x5fc] ss:$28 sps:$4 sm:$0xff]  }
 0x4e6   :  { %v5537_v39 = vld [vmem:[#allocation11 + $0x5f8] ss:$28 sps:$4 sm:$0xff]  }
 0x4e7   :  { %3977 = vmatpush1.bf16.msra.mxu0 %v5459_v40  ;;  %v5542_v40 = vld [vmem:[#allocation11 + $0x634] ss:$28 sps:$4 sm:$0xff]  }
 0x4e8   :  { %4765 = vmatpush3.bf16.msra.mxu1 %v5463_v41  ;;  %3978 = vmatprep.subr.bf16.mxu0 %v5466_v42  ;;  %v5540_v41 = vld [vmem:[#allocation11 + $0x630] ss:$28 sps:$4 sm:$0xff]  }
 0x4e9   :  { %4772 = vmatprep.subr.bf16.mxu1 %v5467_v44  ;;  %v5545_v42 = vld [vmem:[#allocation11 + $0x66c] ss:$28 sps:$4 sm:$0xff]  }
 0x4ea   :  { %v5543_v44 = vld [vmem:[#allocation11 + $0x668] ss:$28 sps:$4 sm:$0xff]  }
 0x4eb   :  { %4077 = vmatmul.mubr.bf16.vlgmr.msra.gmra.mrb[20].mxu1 %v6004_v61  ;;  %3979 = vmatpush1.bf16.msra.mxu0 %v5464_v47  ;;  %v5548_v47 = vld [vmem:[#allocation11 + $0x6a4] ss:$28 sps:$4 sm:$0xff]  }
 0x4ec   :  { %4773 = vmatpush3.bf16.msra.mxu1 %v5468_v48  ;;  %4116 = vmatprep.mubr.bf16.mxu1 %v6008_v1  ;;  %v5546_v48 = vld [vmem:[#allocation11 + $0x6a0] ss:$28 sps:$4 sm:$0xff]  }
 0x4ed   :  { %3980 = vmatprep.subr.bf16.mxu0 %v5471_v49  ;;  %4774 = vmatprep.subr.bf16.mxu1 %v5472_v50  ;;  %v5551_v49 = vld [vmem:[#allocation11 + $0x6dc] ss:$28 sps:$4 sm:$0xff]  }
 0x4ee   :  { %v5549_v50 = vld [vmem:[#allocation11 + $0x6d8] ss:$28 sps:$4 sm:$0xff]  }
 0x4ef   :  { %3981 = vmatpush1.bf16.msra.mxu0 %v5469_v51  ;;  %v6032_v51 = vld [vmem:[%s6081_s9] sm:$0xff]  ;;  %s5784_s9 = smov [#allocation14]  }
 0x4f0   :  { %4775 = vmatpush3.bf16.msra.mxu1 %v5473_v52  ;;  %3982 = vmatprep.subr.bf16.mxu0 %v5476_v53  ;;  %v2614_v52 = vrot.slane %v6032_v51, %v5964_v27  ;;  %v2622_v53 = vrot.slane %v6032_v51, %v5978_v45  ;;  %s4190_s20 = sshll.u32 %s5784_s9, 4  ;;  %s4191_s20 = int_to_ptr.vmem [resolvable:$true] %s4190_s20 }
 0x4f1   :  { %4776 = vmatprep.subr.bf16.mxu1 %v5477_v54  ;;  %v2618_v54 = vrot.slane %v6032_v51, %v5970_v29  ;;  %s5714_s16 = scalar_lea.vmem %s4191_s20, 128  ;;  %p5719_p7 = scmp.lt.s32.totalorder %s4191_s20, %s4191_s20 }
 0x4f2   :  { %p5715_p6 = scmp.ne.s32.totalorder %s4191_s20, %s5714_s16  ;;  %p5720_p8 = scmp.lt.s32.totalorder %s5714_s16, %s5714_s16 }
 0x4f3   :  { %3983 = vmatpush1.bf16.msra.mxu0 %v5474_v55  ;;  %v2626_v55 = vrot.slane %v6032_v51, %v5981_v46 }
 0x4f4   :  { %4777 = vmatpush3.bf16.msra.mxu1 %v5478_v56  ;;  %3984 = vmatprep.subr.bf16.mxu0 %v5481_v57  ;;  %p5721_p9 = por %p5720_p8, %p5719_p7 }
 0x4f5   :  { %4778 = vmatprep.subr.bf16.mxu1 %v5482_v59 }
 0x4f6   :  { %p5722_p10 = pnand %p5721_p9, %p5715_p6 }
 0x4f7   :  { %3985 = vmatpush1.bf16.msra.mxu0 %v5479_v60 }
 0x4f8   :  { %4779 = vmatpush3.bf16.msra.mxu1 %v5483_v62  ;;  %3986 = vmatprep.subr.bf16.mxu0 %v5486_v63 }
 0x4f9   :  { %4780 = vmatprep.subr.bf16.mxu1 %v5487_v2 }
 0x4fb   :  { %3987 = vmatpush1.bf16.msra.mxu0 %v5484_v3 }
 0x4fc   :  { %4781 = vmatpush3.bf16.msra.mxu1 %v5488_v4  ;;  %3988 = vmatprep.subr.bf16.mxu0 %v5491_v5 }
 0x4fd   :  { %4782 = vmatprep.subr.bf16.mxu1 %v5492_v6 }
 0x4ff   :  { %3989 = vmatpush1.bf16.msra.mxu0 %v5489_v7 }
 0x500   :  { %4783 = vmatpush3.bf16.msra.mxu1 %v5493_v0  ;;  %3990 = vmatprep.subr.bf16.mxu0 %v5496_v38 }
 0x501   :  { %4784 = vmatprep.subr.bf16.mxu1 %v5497_v8 }
 0x503   :  { %3991 = vmatpush1.bf16.msra.mxu0 %v5494_v9 }
 0x504   :  { %4785 = vmatpush3.bf16.msra.mxu1 %v5498_v43  ;;  %3992 = vmatprep.subr.bf16.mxu0 %v5501_v11 }
 0x505   :  { %4786 = vmatprep.subr.bf16.mxu1 %v5502_v12 }
 0x507   :  { %3993 = vmatpush1.bf16.msra.mxu0 %v5499_v13 }
 0x508   :  { %4787 = vmatpush3.bf16.msra.mxu1 %v5503_v14  ;;  %4003 = vmatprep.subr.bf16.mxu0 %v5506_v36 }
 0x50a   :  { %3995 = vmatmul.mubr.bf16.vlgmr.msra.gmra.mrb[16].mxu0 %v6004_v61  ;;  %v5521_v61 = vld [vmem:[#allocation11 + $0x4ac] ss:$28 sps:$4 sm:$0xff]  }
 0x50b   :  { %4117 = vmatmul.mubr.bf16.vlgmr.msra.gmra.mrb[24].mxu1 %v6017_v10  ;;  %4004 = vmatpush1.bf16.msra.mxu0 %v5504_v15 }
 0x50c   :  { %4035 = vmatprep.mubr.bf16.mxu0 %v6008_v1  ;;  %4005 = vmatprep.subr.bf16.mxu0 %v5509_v16  ;;  %v5522_v1 = vld [vmem:[#allocation11 + $0x4e0] ss:$28 sps:$4 sm:$0xff]  }
 0x50f   :  { %4006 = vmatpush1.bf16.msra.mxu0 %v5507_v17 }
 0x510   :  { %4007 = vmatprep.subr.bf16.mxu0 %v5512_v18 }
 0x513   :  { %4008 = vmatpush1.bf16.msra.mxu0 %v5510_v19 }
 0x514   :  { %4009 = vmatprep.subr.bf16.mxu0 %v5515_v20 }
 0x517   :  { %4010 = vmatpush1.bf16.msra.mxu0 %v5513_v21 }
 0x518   :  { %4011 = vmatprep.subr.bf16.mxu0 %v5518_v22 }
 0x51b   :  { %4012 = vmatpush1.bf16.msra.mxu0 %v5516_v58 }
 0x51c   :  { %4013 = vmatprep.subr.bf16.mxu0 %v5521_v61 }
 0x51f   :  { %4014 = vmatpush1.bf16.msra.mxu0 %v5519_v23 }
 0x520   :  { %4015 = vmatprep.subr.bf16.mxu0 %v5524_v24 }
 0x523   :  { %4016 = vmatpush1.bf16.msra.mxu0 %v5522_v1 }
 0x524   :  { %4017 = vmatprep.subr.bf16.mxu0 %v5527_v25 }
 0x527   :  { %4018 = vmatpush1.bf16.msra.mxu0 %v5525_v28 }
 0x528   :  { %4019 = vmatprep.subr.bf16.mxu0 %v5530_v30 }
 0x52b   :  { %4020 = vmatpush1.bf16.msra.mxu0 %v5528_v31 }
 0x52c   :  { %4021 = vmatprep.subr.bf16.mxu0 %v5533_v32 }
 0x52f   :  { %4022 = vmatpush1.bf16.msra.mxu0 %v5531_v33 }
 0x530   :  { %4023 = vmatprep.subr.bf16.mxu0 %v5536_v34 }
 0x533   :  { %4024 = vmatpush1.bf16.msra.mxu0 %v5534_v35 }
 0x534   :  { %4025 = vmatprep.subr.bf16.mxu0 %v5539_v37 }
 0x537   :  { %4026 = vmatpush1.bf16.msra.mxu0 %v5537_v39 }
 0x538   :  { %4027 = vmatprep.subr.bf16.mxu0 %v5542_v40 }
 0x53b   :  { %4028 = vmatpush1.bf16.msra.mxu0 %v5540_v41 }
 0x53c   :  { %4029 = vmatprep.subr.bf16.mxu0 %v5545_v42 }
 0x53f   :  { %4030 = vmatpush1.bf16.msra.mxu0 %v5543_v44 }
 0x540   :  { %4031 = vmatprep.subr.bf16.mxu0 %v5548_v47 }
 0x543   :  { %4032 = vmatpush1.bf16.msra.mxu0 %v5546_v48 }
 0x544   :  { %4033 = vmatprep.subr.bf16.mxu0 %v5551_v49 }
 0x547   :  { %4034 = vmatpush1.bf16.msra.mxu0 %v5549_v50 }
 0x54a   :  { %4036 = vmatmul.mubr.bf16.vlgmr.msra.gmra.mrb[16].mxu0 %v6017_v10 }
 0x59d   :  { %v3873_v56 = vpop.f32.mrb[12].mxu0  ;;  %v3955_v57 = vpop.f32.mrb[16].mxu1 }
 0x59e   :  { %v4800_v10 = vadd.f32 %v3873_v56, %v2614_v52  ;;  %v4802_v59 = vadd.f32 %v3955_v57, %v2622_v53  ;;  %v3875_v60 = vpop.f32.mrb[13].mxu0  ;;  %v3957_v62 = vpop.f32.mrb[17].mxu1 }
 0x59f   :  { %v4801_v63 = vadd.f32 %v3875_v60, %v2618_v54  ;;  %v4803_v2 = vadd.f32 %v3957_v62, %v2626_v55  ;;  %v3877_v3 = vpop.f32.mrb[14].mxu0  ;;  %v3959_v4 = vpop.f32.mrb[18].mxu1 }
 0x5a0   :  { %v4699_v27 = vmul.f32 -1.442695, %v4800_v10  ;;  %v4701_v5 = vmul.f32 -1.442695, %v4802_v59  ;;  %v3878_v6 = vpop.f32.mrb[15].mxu0  ;;  %v3960_v45 = vpop.f32.mrb[19].mxu1 }
 0x5a1   :  { %v4700_v7 = vmul.f32 -1.442695, %v4801_v63  ;;  %v4702_v0 = vmul.f32 -1.442695, %v4803_v2 }
 0x5a2   :  { %5554 = vpow2.f32 %v4699_v27 }
 0x5a3   :  { %5556 = vpow2.f32 %v4701_v5 }
 0x5a4   :  { %5558 = vpow2.f32 %v4700_v7 }
 0x5a5   :  { %5560 = vpow2.f32 %v4702_v0 }
 0x5ac   :  { %v5555_v29 = vpop.eup %5554 }
 0x5ad   :  { %v5557_v46 = vpop.eup %5556  ;;  %v4145_v38 = vadd.f32 1.0, %v5555_v29 }
 0x5ae   :  { %v5559_v8 = vpop.eup %5558  ;;  %v4147_v9 = vadd.f32 1.0, %v5557_v46 }
 0x5af   :  { %v5561_v43 = vpop.eup %5560  ;;  %5562 = vrcp.f32 %v4145_v38  ;;  %v4146_v11 = vadd.f32 1.0, %v5559_v8 }
 0x5b0   :  { %5564 = vrcp.f32 %v4147_v9  ;;  %v4148_v12 = vadd.f32 1.0, %v5561_v43 }
 0x5b1   :  { %5566 = vrcp.f32 %v4146_v11 }
 0x5b2   :  { %5568 = vrcp.f32 %v4148_v12 }
 0x5b9   :  { %v5563_v13 = vpop.eup %5562 }
 0x5ba   :  { %v5565_v14 = vpop.eup %5564  ;;  %4166 = vst [vmem:[#allocation13] sm:$0xff] %v5563_v13 }
 0x5bb   :  { %v5567_v36 = vpop.eup %5566  ;;  %4168 = vst [vmem:[#allocation13 + $0x10] sm:$0xff] %v5565_v14 }
 0x5bc   :  { %v5569_v15 = vpop.eup %5568  ;;  %4167 = vst [vmem:[#allocation13 + $0x8] sm:$0xff] %v5567_v36 }
 0x5bd   :  { %4169 = vst [vmem:[#allocation13 + $0x18] sm:$0xff] %v5569_v15 }
 0x5be   :  { %v4766_v16 = vpop.f32.mrb[20].mxu1 }
 0x5bf   :  { %5725 = shalt.err (!%p5722_p10)
}
 0x5c0   :  { %s5726_s2 = scalar_lea.hbm %s6083_s11, 128 }
 0x5c1   :  { %p5727_p11 = scmp.ne.s32.totalorder %s6083_s11, %s5726_s2  ;;  %p5730_p12 = scmp.lt.u32.totalorder %s5726_s2, %s6083_s11 }
 0x5c3   :  { %p5732_p13 = pnand %p5730_p12, %p5727_p11 }
 0x5c5   :  { %5735 = shalt.err (!%p5732_p13)
}
 0x5c6   :  { %4193 = dma.vmem_to_hbm [thread:$0]  %s4191_s20, 128, %s6083_s11, [#allocation15]   ;;  %v4767_v17 = vpop.f32.mrb[21].mxu1  ;;  %v2637_v21 = vsub.s32 6, %v5961_v26  ;;  %v2629_v34 = vsub.s32 4, %v5961_v26  ;;  %v2633_v35 = vsub.s32 5, %v5961_v26 }
 0x5c7   :  { %v4768_v18 = vadd.f32 %v4767_v17, %v4766_v16  ;;  %v4769_v19 = vpop.f32.mrb[22].mxu1  ;;  %s5785_s11 = smov [#allocation13]  }
 0x5c8   :  { %v4770_v20 = vpop.f32.mrb[23].mxu1  ;;  %v2638_v22 = vrot.slane %v6032_v51, %v2637_v21  ;;  %v2630_v37 = vrot.slane %v6032_v51, %v2629_v34  ;;  %v2634_v39 = vrot.slane %v6032_v51, %v2633_v35  ;;  %s4180_s24 = sshll.u32 %s5785_s11, 4  ;;  %s4181_s24 = int_to_ptr.vmem [resolvable:$true] %s4180_s24 }
 0x5c9   :  { %s5736_s26 = scalar_lea.vmem %s4181_s24, 896  ;;  %p5741_p1 = scmp.lt.s32.totalorder %s4181_s24, %s4181_s24 }
 0x5ca   :  { %v4079_v23 = vadd.f32 %v4768_v18, %v2638_v22  ;;  %p5737_p0 = scmp.ne.s32.totalorder %s4181_s24, %s5736_s26  ;;  %p5742_p2 = scmp.lt.s32.totalorder %s5736_s26, %s5736_s26 }
 0x5cc   :  { %p5743_p3 = por %p5742_p2, %p5741_p1 }
 0x5ce   :  { %p5744_p4 = pnand %p5743_p3, %p5737_p0 }
 0x5de   :  { %v4788_v58 = vpop.f32.mrb[24].mxu1 }
 0x5df   :  { %v4789_v61 = vpop.f32.mrb[25].mxu1 }
 0x5e0   :  { %v4790_v24 = vadd.f32 %v4789_v61, %v4788_v58  ;;  %v4791_v1 = vpop.f32.mrb[26].mxu1 }
 0x5e1   :  { %v4792_v25 = vpop.f32.mrb[27].mxu1 }
 0x5e2   :  { %v4119_v28 = vadd.f32 %v4790_v24, %v4079_v23 }
 0x5e4   :  { %v4705_v30 = vmul.f32 -1.442695, %v4119_v28 }
 0x5e6   :  { %5570 = vpow2.f32 %v4705_v30 }
 0x5f0   :  { %v5571_v31 = vpop.eup %5570 }
 0x5f1   :  { %v4151_v32 = vadd.f32 1.0, %v5571_v31 }
 0x5f3   :  { %5572 = vrcp.f32 %v4151_v32 }
 0x5fd   :  { %v5573_v33 = vpop.eup %5572 }
 0x5fe   :  { %4172 = vst [vmem:[#allocation13 + $0x30] sm:$0xff] %v5573_v33 }
 0x61d   :  { %v4037_v40 = vpop.f32.mrb[16].mxu0 }
 0x61e   :  { %v4804_v41 = vadd.f32 %v4037_v40, %v2630_v37  ;;  %v4039_v42 = vpop.f32.mrb[17].mxu0 }
 0x61f   :  { %v4805_v44 = vadd.f32 %v4039_v42, %v2634_v39  ;;  %v4041_v47 = vpop.f32.mrb[18].mxu0 }
 0x620   :  { %v4703_v48 = vmul.f32 -1.442695, %v4804_v41  ;;  %v4042_v49 = vpop.f32.mrb[19].mxu0 }
 0x621   :  { %v4704_v50 = vmul.f32 -1.442695, %v4805_v44 }
 0x622   :  { %5574 = vpow2.f32 %v4703_v48 }
 0x623   :  { %5576 = vpow2.f32 %v4704_v50 }
 0x62c   :  { %v5575_v52 = vpop.eup %5574 }
 0x62d   :  { %v5577_v53 = vpop.eup %5576  ;;  %v4149_v54 = vadd.f32 1.0, %v5575_v52 }
 0x62e   :  { %v4150_v55 = vadd.f32 1.0, %v5577_v53 }
 0x62f   :  { %5578 = vrcp.f32 %v4149_v54 }
 0x630   :  { %5580 = vrcp.f32 %v4150_v55 }
 0x639   :  { %v5579_v26 = vpop.eup %5578 }
 0x63a   :  { %v5581_v51 = vpop.eup %5580  ;;  %4170 = vst [vmem:[#allocation13 + $0x20] sm:$0xff] %v5579_v26 }
 0x63b   :  { %4171 = vst [vmem:[#allocation13 + $0x28] sm:$0xff] %v5581_v51 }
 0x63c   :  { %5747 = shalt.err (!%p5744_p4)
}
 0x63d   :  { %s5748_s6 = scalar_lea.hbm %s6082_s10, 896 }
 0x63e   :  { %p5749_p5 = scmp.ne.s32.totalorder %s6082_s10, %s5748_s6  ;;  %p5752_p6 = scmp.lt.u32.totalorder %s5748_s6, %s6082_s10 }
 0x640   :  { %p5754_p7 = pnand %p5752_p6, %p5749_p5 }
 0x642   :  { %5757 = shalt.err (!%p5754_p7)
}
 0x643   :  { %4183 = dma.vmem_to_hbm [thread:$0]  %s4181_s24, 896, %s6082_s10, [#allocation4]  }
 0x644   :  { %5766 = dma.done.wait [#allocation4], 896  }
 0x645   :  { %5767 = vsyncadd [#allocation4], 4294966400 }
 0x646   :  { %5768 = dma.done.wait [#allocation15], 128  }
 0x647   :  { %5769 = vsyncadd [#allocation15], 4294967168 }
 0x648   :  { %4200 = vsyncpa [#allocation3], 1 }
 0x649   :  { %4201 = vsyncpa [#allocation6], 1 }
 0x64a   :  { %4202 = vsyncpa [#allocation9], 1 }
 0x64b   :  { %4203 = vsyncpa [#allocation12], 1 }
 0x64c   :  { %4204 = vsyncpa [#allocation4], 1 }
 0x64d   :  { %4205 = vsyncpa [#allocation15], 1 }

</bundles_post_ra>
